<compile_context>
chip_gen: v6e
topology: v6e:2x2x1
jax: 0.10.0
libtpu: 0.0.40
codegen_flags: <defaults>
</compile_context>

<pallas_src>
import jax
import jax.numpy as jnp
from jax.experimental import pallas as pl
from jax.experimental.pallas import tpu as pltpu

# (in_features, out_features, fan_in_k) mirroring BinaryLogicMNIST.__init__
LAYER_SPECS = [
    (28 * 28, 16, 4),
    (16, 16, 4),
    (16, 16, 4),
    (16, 16, 4),
    (16, 16, 4),
    (16, 16, 1),
    (16, 10, None),
]

_LANE = 128        # lane width: pad the logits dim to this for dense stores
_ROW_ALIGN = 32    # int8 packs 4 rows/sublane -> keep batch tiles 32-aligned


def _btnn_forward_kernel(x_ref, w0_ref, w_hid_ref, w_last_ref,
                         b0_ref, b_hid_ref, b_last_ref, out_ref):
    """Fused MLP forward for one batch tile: 7 matmuls + biases + sign in VMEM."""
    # int8 -> bf16 cast happens in-kernel (VPU); HBM only carried 1 B/pixel.
    h = x_ref[...].astype(jnp.bfloat16)                       # (TB, 784)

    # Layer 0: 784 -> 16
    acc = jnp.dot(h, w0_ref[...], preferred_element_type=jnp.float32)
    acc = acc + b0_ref[...]
    h = jnp.where(acc >= 0, 1.0, -1.0).astype(jnp.bfloat16)   # binary sign act

    # Layers 1..5: five 16 -> 16 layers, weights stacked as (5, 16, 16)
    for li in range(w_hid_ref.shape[0]):
        acc = jnp.dot(h, w_hid_ref[li], preferred_element_type=jnp.float32)
        acc = acc + b_hid_ref[li]
        h = jnp.where(acc >= 0, 1.0, -1.0).astype(jnp.bfloat16)

    # Final layer: 16 -> 10, zero-padded to 128 lanes; linear output.
    acc = jnp.dot(h, w_last_ref[...], preferred_element_type=jnp.float32)
    acc = acc + b_last_ref[...]
    out_ref[...] = acc.astype(out_ref.dtype)                  # (TB, 128) bf16 store


def btnn_forward(x, weights, biases, *, block_b=2048):
    """x: (B, 784) binary pixels (any float/int dtype). Returns (B, 10) f32 logits."""
    B, din0 = x.shape
    out_dim = weights[-1].shape[1]

    # int8 input stream; bf16 weights; f32 biases (accumulation is f32).
    x_i8 = x.astype(jnp.int8)
    w0 = weights[0].astype(jnp.bfloat16)                                  # (784, 16)
    b0 = biases[0].astype(jnp.float32).reshape(1, -1)                     # (1, 16)
    w_hid = jnp.stack([w.astype(jnp.bfloat16) for w in weights[1:-1]])    # (5, 16, 16)
    b_hid = jnp.stack([b.astype(jnp.float32).reshape(1, -1)
                       for b in biases[1:-1]])                            # (5, 1, 16)

    # Lane-dense output path: zero-pad last layer out_dim -> 128 columns.
    w_last = (jnp.zeros((weights[-1].shape[0], _LANE), jnp.bfloat16)
              .at[:, :out_dim].set(weights[-1].astype(jnp.bfloat16)))     # (16, 128)
    b_last = (jnp.zeros((1, _LANE), jnp.float32)
              .at[:, :out_dim].set(biases[-1].astype(jnp.float32).reshape(1, -1)))

    # Batch tile: 32-aligned, and at most ceil(B/2) so v7x's 2 TCs both get work.
    tb = int(min(block_b, B))
    tb = max(_ROW_ALIGN, ((tb + _ROW_ALIGN - 1) // _ROW_ALIGN) * _ROW_ALIGN)
    if B >= 2 * _ROW_ALIGN:
        half = (((B + 1) // 2) + _ROW_ALIGN - 1) // _ROW_ALIGN * _ROW_ALIGN
        tb = min(tb, half)
    n_blocks = pl.cdiv(B, tb)
    b_pad = n_blocks * tb
    if b_pad != B:
        # Only hit for ragged batches; int8 makes this tail pad cheap.
        x_i8 = jnp.pad(x_i8, ((0, b_pad - B), (0, 0)))

    def resident(arr):
        nd = arr.ndim
        return pl.BlockSpec(arr.shape, lambda i, _nd=nd: (0,) * _nd)

    in_specs = [
        pl.BlockSpec((tb, din0), lambda i: (i, 0)),   # x tile marches over batch
        resident(w0), resident(w_hid), resident(w_last),
        resident(b0), resident(b_hid), resident(b_last),
    ]
    out_specs = pl.BlockSpec((tb, _LANE), lambda i: (i, 0))

    flops = 2 * b_pad * (din0 * 16 + w_hid.shape[0] * 16 * 16 + 16 * _LANE)
    bytes_accessed = (
        b_pad * din0 * 1                                   # int8 x stream
        + w0.size * 2 + w_hid.size * 2 + w_last.size * 2   # bf16 weights
        + b0.size * 4 + b_hid.size * 4 + b_last.size * 4   # f32 biases
        + b_pad * _LANE * 2                                # bf16 output
    )

    out_padded = pl.pallas_call(
        _btnn_forward_kernel,
        out_shape=jax.ShapeDtypeStruct((b_pad, _LANE), jnp.bfloat16),
        grid=(n_blocks,),
        in_specs=in_specs,
        out_specs=out_specs,
        compiler_params=pltpu.CompilerParams(
            dimension_semantics=("parallel",),      # megacore batch split on v7x
            vmem_limit_bytes=48 * 1024 * 1024,      # headroom on 64 MiB v7x
        ),
        cost_estimate=pl.CostEstimate(
            flops=flops,
            transcendentals=0,
            bytes_accessed=bytes_accessed,
        ),
    )(x_i8, w0, w_hid, w_last, b0, b_hid, b_last)

    return out_padded[:B, :out_dim].astype(jnp.float32)


def init_params(key):
    """Deterministic parameter init matching the layer shapes of BinaryLogicMNIST."""
    weights, biases = [], []
    for (din, dout, _k) in LAYER_SPECS:
        key, kw, kb = jax.random.split(key, 3)
        scale = 1.0 / jnp.sqrt(jnp.float32(din))
        weights.append(jax.random.normal(kw, (din, dout), dtype=jnp.float32) * scale)
        biases.append(jax.random.normal(kb, (1, dout), dtype=jnp.float32) * 0.01)
    return weights, biases


def reference_forward(x, weights, biases):
    """Pure-JAX reference mirroring the kernel's dtype path exactly."""
    n = len(weights)
    h = x.astype(jnp.int8).astype(jnp.bfloat16)
    for li, (w, b) in enumerate(zip(weights, biases)):
        acc = jnp.dot(h, w.astype(jnp.bfloat16), preferred_element_type=jnp.float32)
        acc = acc + b.astype(jnp.float32).reshape(1, -1)
        if li < n - 1:
            h = jnp.where(acc >= 0, 1.0, -1.0).astype(jnp.bfloat16)
        else:
            return acc.astype(jnp.bfloat16).astype(jnp.float32)


if __name__ == "__main__":
    key = jax.random.PRNGKey(0)
    key, kx = jax.random.split(key)

    B = 256  # demo batch; tiles to 128-row blocks -> 2 grid steps (both v7x TCs busy)
    # Binary MNIST-like input: flattened 28*28 = 784 features in {0, 1}.
    x = jax.random.bernoulli(kx, p=0.3, shape=(B, 28 * 28)).astype(jnp.float32)

    weights, biases = init_params(key)

    out = jax.block_until_ready(btnn_forward(x, weights, biases))
    ref = jax.block_until_ready(reference_forward(x, weights, biases))

    assert out.shape == (B, 10), out.shape
    assert jnp.allclose(out, ref, atol=5e-3, rtol=5e-3), "mismatch vs JAX reference"

    print("KERNEL_OK")
</pallas_src>

<mosaic_0001>
module attributes {stable_mosaic.version = 11 : i64} {
  func.func @_btnn_forward_kernel(%arg0: i32, %arg1: memref<128x784xi8, #tpu.memory_space<vmem>>, %arg2: memref<784x16xbf16, #tpu.memory_space<vmem>>, %arg3: memref<5x16x16xbf16, #tpu.memory_space<vmem>>, %arg4: memref<16x128xbf16, #tpu.memory_space<vmem>>, %arg5: memref<1x16xf32, #tpu.memory_space<vmem>>, %arg6: memref<5x1x16xf32, #tpu.memory_space<vmem>>, %arg7: memref<1x128xf32, #tpu.memory_space<vmem>>, %arg8: memref<128x128xbf16, #tpu.memory_space<vmem>>) attributes {dimension_semantics = [#tpu.dimension_semantics<parallel>], iteration_bounds = array<i64: 2>, scalar_prefetch = 0 : i64, scratch_operands = 0 : i64, tpu.core_type = #tpu.core_type<tc>, window_params = [{transform_indices = @transform_0, window_bounds = array<i64: 128, 784>}, {pipeline_mode = #tpu.pipeline_mode<synchronous>, transform_indices = @transform_1, window_bounds = array<i64: 784, 16>}, {pipeline_mode = #tpu.pipeline_mode<synchronous>, transform_indices = @transform_2, window_bounds = array<i64: 5, 16, 16>}, {pipeline_mode = #tpu.pipeline_mode<synchronous>, transform_indices = @transform_3, window_bounds = array<i64: 16, 128>}, {pipeline_mode = #tpu.pipeline_mode<synchronous>, transform_indices = @transform_4, window_bounds = array<i64: 1, 16>}, {pipeline_mode = #tpu.pipeline_mode<synchronous>, transform_indices = @transform_5, window_bounds = array<i64: 5, 1, 16>}, {pipeline_mode = #tpu.pipeline_mode<synchronous>, transform_indices = @transform_6, window_bounds = array<i64: 1, 128>}, {transform_indices = @transform_7, window_bounds = array<i64: 128, 128>}]} {
    %c0 = arith.constant 0 : index
    %c0_0 = arith.constant 0 : index
    %0 = vector.load %arg1[%c0, %c0_0] : memref<128x784xi8, #tpu.memory_space<vmem>>, vector<128x784xi8>
    %1 = arith.sitofp %0 : vector<128x784xi8> to vector<128x784xbf16>
    %c0_1 = arith.constant 0 : index
    %c0_2 = arith.constant 0 : index
    %2 = vector.load %arg2[%c0_1, %c0_2] : memref<784x16xbf16, #tpu.memory_space<vmem>>, vector<784x16xbf16>
    %cst = arith.constant dense<0.000000e+00> : vector<128x16xf32>
    %3 = tpu.matmul %1, %2, %cst {dimension_numbers = #tpu.dot_dimension_numbers<[1], [0], [0], [1], [0, 0, 1, 1], [], []>} : vector<128x784xbf16>, vector<784x16xbf16>, vector<128x16xf32> -> vector<128x16xf32>
    %c0_3 = arith.constant 0 : index
    %c0_4 = arith.constant 0 : index
    %4 = vector.load %arg5[%c0_3, %c0_4] : memref<1x16xf32, #tpu.memory_space<vmem>>, vector<1x16xf32>
    %5 = vector.broadcast %4 : vector<1x16xf32> to vector<128x16xf32>
    %6 = arith.addf %3, %5 : vector<128x16xf32>
    %cst_5 = arith.constant 0.000000e+00 : f32
    %7 = vector.broadcast %cst_5 : f32 to vector<128x16xf32>
    %8 = arith.cmpf oge, %6, %7 : vector<128x16xf32>
    %cst_6 = arith.constant 1.000000e+00 : f32
    %cst_7 = arith.constant -1.000000e+00 : f32
    %9 = vector.broadcast %cst_6 : f32 to vector<128x16xf32>
    %10 = vector.broadcast %cst_7 : f32 to vector<128x16xf32>
    %11 = arith.select %8, %9, %10 : vector<128x16xi1>, vector<128x16xf32>
    %12 = arith.truncf %11 : vector<128x16xf32> to vector<128x16xbf16>
    %c0_8 = arith.constant 0 : index
    %c0_9 = arith.constant 0 : index
    %c0_10 = arith.constant 0 : index
    %13 = vector.load %arg3[%c0_8, %c0_9, %c0_10] : memref<5x16x16xbf16, #tpu.memory_space<vmem>>, vector<1x16x16xbf16>
    %14 = vector.shape_cast %13 : vector<1x16x16xbf16> to vector<16x16xbf16>
    %cst_11 = arith.constant dense<0.000000e+00> : vector<128x16xf32>
    %15 = tpu.matmul %12, %14, %cst_11 {dimension_numbers = #tpu.dot_dimension_numbers<[1], [0], [0], [1], [0, 0, 1, 1], [], []>} : vector<128x16xbf16>, vector<16x16xbf16>, vector<128x16xf32> -> vector<128x16xf32>
    %c0_12 = arith.constant 0 : index
    %c0_13 = arith.constant 0 : index
    %c0_14 = arith.constant 0 : index
    %16 = vector.load %arg6[%c0_12, %c0_13, %c0_14] : memref<5x1x16xf32, #tpu.memory_space<vmem>>, vector<1x1x16xf32>
    %17 = vector.shape_cast %16 : vector<1x1x16xf32> to vector<1x16xf32>
    %18 = vector.broadcast %17 : vector<1x16xf32> to vector<128x16xf32>
    %19 = arith.addf %15, %18 : vector<128x16xf32>
    %cst_15 = arith.constant 0.000000e+00 : f32
    %20 = vector.broadcast %cst_15 : f32 to vector<128x16xf32>
    %21 = arith.cmpf oge, %19, %20 : vector<128x16xf32>
    %cst_16 = arith.constant 1.000000e+00 : f32
    %cst_17 = arith.constant -1.000000e+00 : f32
    %22 = vector.broadcast %cst_16 : f32 to vector<128x16xf32>
    %23 = vector.broadcast %cst_17 : f32 to vector<128x16xf32>
    %24 = arith.select %21, %22, %23 : vector<128x16xi1>, vector<128x16xf32>
    %25 = arith.truncf %24 : vector<128x16xf32> to vector<128x16xbf16>
    %c1 = arith.constant 1 : index
    %c0_18 = arith.constant 0 : index
    %c0_19 = arith.constant 0 : index
    %26 = vector.load %arg3[%c1, %c0_18, %c0_19] : memref<5x16x16xbf16, #tpu.memory_space<vmem>>, vector<1x16x16xbf16>
    %27 = vector.shape_cast %26 : vector<1x16x16xbf16> to vector<16x16xbf16>
    %cst_20 = arith.constant dense<0.000000e+00> : vector<128x16xf32>
    %28 = tpu.matmul %25, %27, %cst_20 {dimension_numbers = #tpu.dot_dimension_numbers<[1], [0], [0], [1], [0, 0, 1, 1], [], []>} : vector<128x16xbf16>, vector<16x16xbf16>, vector<128x16xf32> -> vector<128x16xf32>
    %c1_21 = arith.constant 1 : index
    %c0_22 = arith.constant 0 : index
    %c0_23 = arith.constant 0 : index
    %29 = vector.load %arg6[%c1_21, %c0_22, %c0_23] : memref<5x1x16xf32, #tpu.memory_space<vmem>>, vector<1x1x16xf32>
    %30 = vector.shape_cast %29 : vector<1x1x16xf32> to vector<1x16xf32>
    %31 = vector.broadcast %30 : vector<1x16xf32> to vector<128x16xf32>
    %32 = arith.addf %28, %31 : vector<128x16xf32>
    %cst_24 = arith.constant 0.000000e+00 : f32
    %33 = vector.broadcast %cst_24 : f32 to vector<128x16xf32>
    %34 = arith.cmpf oge, %32, %33 : vector<128x16xf32>
    %cst_25 = arith.constant 1.000000e+00 : f32
    %cst_26 = arith.constant -1.000000e+00 : f32
    %35 = vector.broadcast %cst_25 : f32 to vector<128x16xf32>
    %36 = vector.broadcast %cst_26 : f32 to vector<128x16xf32>
    %37 = arith.select %34, %35, %36 : vector<128x16xi1>, vector<128x16xf32>
    %38 = arith.truncf %37 : vector<128x16xf32> to vector<128x16xbf16>
    %c2 = arith.constant 2 : index
    %c0_27 = arith.constant 0 : index
    %c0_28 = arith.constant 0 : index
    %39 = vector.load %arg3[%c2, %c0_27, %c0_28] : memref<5x16x16xbf16, #tpu.memory_space<vmem>>, vector<1x16x16xbf16>
    %40 = vector.shape_cast %39 : vector<1x16x16xbf16> to vector<16x16xbf16>
    %cst_29 = arith.constant dense<0.000000e+00> : vector<128x16xf32>
    %41 = tpu.matmul %38, %40, %cst_29 {dimension_numbers = #tpu.dot_dimension_numbers<[1], [0], [0], [1], [0, 0, 1, 1], [], []>} : vector<128x16xbf16>, vector<16x16xbf16>, vector<128x16xf32> -> vector<128x16xf32>
    %c2_30 = arith.constant 2 : index
    %c0_31 = arith.constant 0 : index
    %c0_32 = arith.constant 0 : index
    %42 = vector.load %arg6[%c2_30, %c0_31, %c0_32] : memref<5x1x16xf32, #tpu.memory_space<vmem>>, vector<1x1x16xf32>
    %43 = vector.shape_cast %42 : vector<1x1x16xf32> to vector<1x16xf32>
    %44 = vector.broadcast %43 : vector<1x16xf32> to vector<128x16xf32>
    %45 = arith.addf %41, %44 : vector<128x16xf32>
    %cst_33 = arith.constant 0.000000e+00 : f32
    %46 = vector.broadcast %cst_33 : f32 to vector<128x16xf32>
    %47 = arith.cmpf oge, %45, %46 : vector<128x16xf32>
    %cst_34 = arith.constant 1.000000e+00 : f32
    %cst_35 = arith.constant -1.000000e+00 : f32
    %48 = vector.broadcast %cst_34 : f32 to vector<128x16xf32>
    %49 = vector.broadcast %cst_35 : f32 to vector<128x16xf32>
    %50 = arith.select %47, %48, %49 : vector<128x16xi1>, vector<128x16xf32>
    %51 = arith.truncf %50 : vector<128x16xf32> to vector<128x16xbf16>
    %c3 = arith.constant 3 : index
    %c0_36 = arith.constant 0 : index
    %c0_37 = arith.constant 0 : index
    %52 = vector.load %arg3[%c3, %c0_36, %c0_37] : memref<5x16x16xbf16, #tpu.memory_space<vmem>>, vector<1x16x16xbf16>
    %53 = vector.shape_cast %52 : vector<1x16x16xbf16> to vector<16x16xbf16>
    %cst_38 = arith.constant dense<0.000000e+00> : vector<128x16xf32>
    %54 = tpu.matmul %51, %53, %cst_38 {dimension_numbers = #tpu.dot_dimension_numbers<[1], [0], [0], [1], [0, 0, 1, 1], [], []>} : vector<128x16xbf16>, vector<16x16xbf16>, vector<128x16xf32> -> vector<128x16xf32>
    %c3_39 = arith.constant 3 : index
    %c0_40 = arith.constant 0 : index
    %c0_41 = arith.constant 0 : index
    %55 = vector.load %arg6[%c3_39, %c0_40, %c0_41] : memref<5x1x16xf32, #tpu.memory_space<vmem>>, vector<1x1x16xf32>
    %56 = vector.shape_cast %55 : vector<1x1x16xf32> to vector<1x16xf32>
    %57 = vector.broadcast %56 : vector<1x16xf32> to vector<128x16xf32>
    %58 = arith.addf %54, %57 : vector<128x16xf32>
    %cst_42 = arith.constant 0.000000e+00 : f32
    %59 = vector.broadcast %cst_42 : f32 to vector<128x16xf32>
    %60 = arith.cmpf oge, %58, %59 : vector<128x16xf32>
    %cst_43 = arith.constant 1.000000e+00 : f32
    %cst_44 = arith.constant -1.000000e+00 : f32
    %61 = vector.broadcast %cst_43 : f32 to vector<128x16xf32>
    %62 = vector.broadcast %cst_44 : f32 to vector<128x16xf32>
    %63 = arith.select %60, %61, %62 : vector<128x16xi1>, vector<128x16xf32>
    %64 = arith.truncf %63 : vector<128x16xf32> to vector<128x16xbf16>
    %c4 = arith.constant 4 : index
    %c0_45 = arith.constant 0 : index
    %c0_46 = arith.constant 0 : index
    %65 = vector.load %arg3[%c4, %c0_45, %c0_46] : memref<5x16x16xbf16, #tpu.memory_space<vmem>>, vector<1x16x16xbf16>
    %66 = vector.shape_cast %65 : vector<1x16x16xbf16> to vector<16x16xbf16>
    %cst_47 = arith.constant dense<0.000000e+00> : vector<128x16xf32>
    %67 = tpu.matmul %64, %66, %cst_47 {dimension_numbers = #tpu.dot_dimension_numbers<[1], [0], [0], [1], [0, 0, 1, 1], [], []>} : vector<128x16xbf16>, vector<16x16xbf16>, vector<128x16xf32> -> vector<128x16xf32>
    %c4_48 = arith.constant 4 : index
    %c0_49 = arith.constant 0 : index
    %c0_50 = arith.constant 0 : index
    %68 = vector.load %arg6[%c4_48, %c0_49, %c0_50] : memref<5x1x16xf32, #tpu.memory_space<vmem>>, vector<1x1x16xf32>
    %69 = vector.shape_cast %68 : vector<1x1x16xf32> to vector<1x16xf32>
    %70 = vector.broadcast %69 : vector<1x16xf32> to vector<128x16xf32>
    %71 = arith.addf %67, %70 : vector<128x16xf32>
    %cst_51 = arith.constant 0.000000e+00 : f32
    %72 = vector.broadcast %cst_51 : f32 to vector<128x16xf32>
    %73 = arith.cmpf oge, %71, %72 : vector<128x16xf32>
    %cst_52 = arith.constant 1.000000e+00 : f32
    %cst_53 = arith.constant -1.000000e+00 : f32
    %74 = vector.broadcast %cst_52 : f32 to vector<128x16xf32>
    %75 = vector.broadcast %cst_53 : f32 to vector<128x16xf32>
    %76 = arith.select %73, %74, %75 : vector<128x16xi1>, vector<128x16xf32>
    %77 = arith.truncf %76 : vector<128x16xf32> to vector<128x16xbf16>
    %c0_54 = arith.constant 0 : index
    %c0_55 = arith.constant 0 : index
    %78 = vector.load %arg4[%c0_54, %c0_55] : memref<16x128xbf16, #tpu.memory_space<vmem>>, vector<16x128xbf16>
    %cst_56 = arith.constant dense<0.000000e+00> : vector<128x128xf32>
    %79 = tpu.matmul %77, %78, %cst_56 {dimension_numbers = #tpu.dot_dimension_numbers<[1], [0], [0], [1], [0, 0, 1, 1], [], []>} : vector<128x16xbf16>, vector<16x128xbf16>, vector<128x128xf32> -> vector<128x128xf32>
    %c0_57 = arith.constant 0 : index
    %c0_58 = arith.constant 0 : index
    %80 = vector.load %arg7[%c0_57, %c0_58] : memref<1x128xf32, #tpu.memory_space<vmem>>, vector<1x128xf32>
    %81 = vector.broadcast %80 : vector<1x128xf32> to vector<128x128xf32>
    %82 = arith.addf %79, %81 : vector<128x128xf32>
    %83 = arith.truncf %82 : vector<128x128xf32> to vector<128x128xbf16>
    %c0_59 = arith.constant 0 : index
    %c0_60 = arith.constant 0 : index
    %84 = vector.load %arg8[%c0_59, %c0_60] : memref<128x128xbf16, #tpu.memory_space<vmem>>, vector<128x128xbf16>
    tpu.vector_store %arg8[%c0_59, %c0_60], %83 {strides = array<i32>} : memref<128x128xbf16, #tpu.memory_space<vmem>>, vector<128x128xbf16>,
    return
  }
  func.func @transform_0(%arg0: i32) -> (i32, i32) {
    %c0_i32 = arith.constant 0 : i32
    %c0_i32_0 = arith.constant 0 : i32
    return %arg0, %c0_i32 : i32, i32
  }
  func.func @transform_1(%arg0: i32) -> (i32, i32) {
    %c0_i32 = arith.constant 0 : i32
    %c0_i32_0 = arith.constant 0 : i32
    %c0_i32_1 = arith.constant 0 : i32
    return %c0_i32, %c0_i32_0 : i32, i32
  }
  func.func @transform_2(%arg0: i32) -> (i32, i32, i32) {
    %c0_i32 = arith.constant 0 : i32
    %c0_i32_0 = arith.constant 0 : i32
    %c0_i32_1 = arith.constant 0 : i32
    %c0_i32_2 = arith.constant 0 : i32
    return %c0_i32, %c0_i32_0, %c0_i32_1 : i32, i32, i32
  }
  func.func @transform_3(%arg0: i32) -> (i32, i32) {
    %c0_i32 = arith.constant 0 : i32
    %c0_i32_0 = arith.constant 0 : i32
    %c0_i32_1 = arith.constant 0 : i32
    return %c0_i32, %c0_i32_0 : i32, i32
  }
  func.func @transform_4(%arg0: i32) -> (i32, i32) {
    %c0_i32 = arith.constant 0 : i32
    %c0_i32_0 = arith.constant 0 : i32
    %c0_i32_1 = arith.constant 0 : i32
    return %c0_i32, %c0_i32_0 : i32, i32
  }
  func.func @transform_5(%arg0: i32) -> (i32, i32, i32) {
    %c0_i32 = arith.constant 0 : i32
    %c0_i32_0 = arith.constant 0 : i32
    %c0_i32_1 = arith.constant 0 : i32
    %c0_i32_2 = arith.constant 0 : i32
    return %c0_i32, %c0_i32_0, %c0_i32_1 : i32, i32, i32
  }
  func.func @transform_6(%arg0: i32) -> (i32, i32) {
    %c0_i32 = arith.constant 0 : i32
    %c0_i32_0 = arith.constant 0 : i32
    %c0_i32_1 = arith.constant 0 : i32
    return %c0_i32, %c0_i32_0 : i32, i32
  }
  func.func @transform_7(%arg0: i32) -> (i32, i32) {
    %c0_i32 = arith.constant 0 : i32
    %c0_i32_0 = arith.constant 0 : i32
    return %arg0, %c0_i32 : i32, i32
  }
}

</mosaic_0001>

<bundles_post_ra>
// kernel: tpu_custom_call.1
= control target key start
LH: loop header
LB: loop body
LE: loop exit
PB: predicated region body
PF: predicated region fallthrough
CT: control target
= control target key end

     0   :  { %12 = vsyncpa [#allocation3], 0  ;;  %s3953_s0 = inlined_call_operand.vmem [shape: s8[256,784], index: 0, kind: input, shape index: {}]   ;;  %s3954_s1 = inlined_call_operand.vmem [shape: bf16[784,16], index: 1, kind: input, shape index: {}]   ;;  %s3955_s2 = inlined_call_operand.vmem [shape: bf16[5,16,16], index: 2, kind: input, shape index: {}]   ;;  %s3956_s3 = inlined_call_operand.vmem [shape: bf16[16,128], index: 3, kind: input, shape index: {}]   ;;  %s3957_s4 = inlined_call_operand.vmem [shape: f32[1,16], index: 4, kind: input, shape index: {}]   ;;  %s3958_s5 = inlined_call_operand.vmem [shape: f32[5,1,16], index: 5, kind: input, shape index: {}]   ;;  %s3959_s6 = inlined_call_operand.vmem [shape: f32[1,128], index: 6, kind: input, shape index: {}]   ;;  %s3960_s7 = inlined_call_operand.hbm [shape: bf16[256,128], index: 7, kind: output, shape index: {}]  }
   0x1   :  { %14 = vsyncpa [#allocation3 + $0x1], 0  ;;  %s3223_s24 = smov 0   ;;  %s3225_s25 = smov 0  }
   0x2   :  { %s3227_s26 = smov 0   ;;  %s3229_s27 = smov 0  }
   0x3 LB: > { %s3244_s28 = sadd.s32 4294967295, %s3177_s27   ;;  %s2400_s29 = sadd.s32 4294967294, %s3177_s27   ;;  %s3177_s27 = sphi %s3229_s27, %s3972_s27   ;;  %s3173_s26 = sphi %s3227_s26, %s3971_s26   ;;  %s3169_s25 = sphi %s3225_s25, %s3970_s25   ;;  %s3165_s24 = sphi %s3223_s24, %s3969_s24  }
   0x4   : > { %s3248_s30 = sadd.s32 1, %s3177_s27   ;;  %s179_s8 = sadd.s32 1, %s3173_s26 }
   0x5   : > { %s176_s9 = ssub.s32 %s3177_s27, %s3248_s30  ;;  %p189_p0 = scmp.ne.s32.totalorder %s3173_s26, %s3169_s25 }
   0x6   : > { %p177_p1 = scmp.eq.s32.totalorder %s176_s9, 0  ;;  %p190_p2 = scmp.eq.s32.totalorder %s3244_s28, 1 }
   0x7   : > { %p195_p3 = scmp.ne.s32.totalorder %s3169_s25, %s3165_s24  ;;  %p196_p4 = scmp.eq.s32.totalorder %s2400_s29, 1 }
   0x8   : > { %s3259_s10 = scalar_select %p177_p1, %s3173_s26, %s179_s8  }
   0x9   : > { %p3261_p5 = por %p190_p2, %p189_p0  ;;  %p3265_p6 = por %p196_p4, %p195_p3 }
   0xa   : > { %p2403_p7 = scmp.ge.s32.totalorder %s3177_s27, 1  ;;  %p242_p8 = scmp.lt.s32.totalorder %s3177_s27, 3 }
   0xc   : > { %p243_p9 = pnand %p2403_p7, %p242_p8 }
   0xe   : > { %246 = sbr.rel (%p243_p9) target bundleno = 1621 (0x655), region = 48 }
  0x13   : > { %v3062_v0 = vld [vmem:[%s3954_s1 + $0x78] sm:$0xff]   ;;  %v3066_v4 = vld [vmem:[%s3954_s1 + $0x70] sm:$0xff]   ;;  %v3070_v8 = vld [vmem:[%s3954_s1 + $0x68] sm:$0xff]   ;;  %s2405_s15 = sshll.u32 %s3244_s28, 2  ;;  %vm767_vm0 = vcmask 130048   ;;  %s272_s18 = sand.u32 1, %s3169_s25  }
  0x14   : > { %v3063_v1 = vld [vmem:[%s3954_s1 + $0xf8] sm:$0xff]   ;;  %2622 = vmatprep.subr.bf16.mxu0 %v3062_v0  ;;  %v3067_v5 = vld [vmem:[%s3954_s1 + $0xf0] sm:$0xff]   ;;  %v3071_v9 = vld [vmem:[%s3954_s1 + $0xe8] sm:$0xff]   ;;  %p276_p10 = scmp.lt.s32.totalorder %s2405_s15, 7  ;;  %s2574_s23 = sshll.u32 %s3244_s28, 10 }
  0x15   : > { %v3064_v2 = vld [vmem:[%s3954_s1 + $0x38] sm:$0xff]   ;;  %2686 = vmatprep.subr.bf16.mxu1 %v3063_v1  ;;  %v3068_v6 = vld [vmem:[%s3954_s1 + $0x30] sm:$0xff]   ;;  %v3072_v10 = vld [vmem:[%s3954_s1 + $0x28] sm:$0xff]   ;;  %s3905_s13 = scalar_lea.hbm %s3960_s7, %s2574_s23  ;;  %s3913_s28 = scalar_lea.sflag [#allocation3], %s272_s18 }
  0x16   : > { %v3065_v3 = vld [vmem:[%s3954_s1 + $0xb8] sm:$0xff]   ;;  %2623 = vmatpush3.bf16.msra.mxu0 %v3064_v2  ;;  %v3069_v7 = vld [vmem:[%s3954_s1 + $0xb0] sm:$0xff]   ;;  %v3073_v11 = vld [vmem:[%s3954_s1 + $0xa8] sm:$0xff]   ;;  %s3974_s15 = smov (!%p276_p10, %s2405_s15), 7  ;;  %s3180_s14 = smov [#allocation2]  }
  0x17   : > { %2687 = vmatpush3.bf16.msra.mxu1 %v3065_v3  ;;  %2624 = vmatprep.subr.bf16.mxu0 %v3066_v4  ;;  %v3074_v12 = vld [vmem:[%s3954_s1 + $0x60] sm:$0xff]   ;;  %v3078_v16 = vld [vmem:[%s3954_s1 + $0x58] sm:$0xff]   ;;  %v3082_v20 = vld [vmem:[%s3954_s1 + $0x50] sm:$0xff]   ;;  %s3019_s8 = smul.u32 56, %s3974_s15  ;;  %s2404_s15 = sshll.u32 %s272_s18, 6 }
  0x18   : > { %2688 = vmatprep.subr.bf16.mxu1 %v3067_v5  ;;  %v3075_v13 = vld [vmem:[%s3954_s1 + $0xe0] sm:$0xff]   ;;  %v3079_v17 = vld [vmem:[%s3954_s1 + $0xd8] sm:$0xff]   ;;  %v3083_v21 = vld [vmem:[%s3954_s1 + $0xd0] sm:$0xff]   ;;  %s3892_s21 = scalar_lea.vmem [#allocation2], %s2404_s15  ;;  %s3121_s16 = sshll.u32 %s3180_s14, 4  ;;  %s3122_s16 = int_to_ptr.vmem [resolvable:$false] %s3121_s16 }
  0x19   : > { %v3076_v14 = vld [vmem:[%s3954_s1 + $0x20] sm:$0xff]   ;;  %v3080_v18 = vld [vmem:[%s3954_s1 + $0x18] sm:$0xff]   ;;  %v3084_v22 = vld [vmem:[%s3954_s1 + $0x10] sm:$0xff]   ;;  %s3365_s22 = scalar_lea.vmem %s3953_s0, %s3019_s8  ;;  %s3123_s17 = scalar_lea.vmem %s3122_s16, 2048 }
  0x1a   : > { %2625 = vmatpush3.bf16.msra.mxu0 %v3068_v6  ;;  %v3077_v15 = vld [vmem:[%s3954_s1 + $0xa0] sm:$0xff]   ;;  %v3081_v19 = vld [vmem:[%s3954_s1 + $0x98] sm:$0xff]   ;;  %v3085_v23 = vld [vmem:[%s3954_s1 + $0x90] sm:$0xff]  }
  0x1b   : > { %2689 = vmatpush3.bf16.msra.mxu1 %v3069_v7  ;;  %2626 = vmatprep.subr.bf16.mxu0 %v3070_v8  ;;  %v3086_v24 = vld [vmem:[%s3954_s1 + $0x48] sm:$0xff]   ;;  %v3090_v28 = vld [vmem:[%s3954_s1 + $0x40] sm:$0xff]   ;;  %v287_v33 = vld [vmem:[%s3365_s22 + $0x18] sm:$0xff] }
  0x1c   : > { %2690 = vmatprep.subr.bf16.mxu1 %v3071_v9  ;;  %v3087_v25 = vld [vmem:[%s3954_s1 + $0xc8] sm:$0xff]   ;;  %v3091_v29 = vld [vmem:[%s3954_s1 + $0xc0] sm:$0xff]   ;;  %v315_v37 = vunpack.c.l.s8.bf16 %v287_v33  ;;  %v286_v38 = vld [vmem:[%s3365_s22 + $0x10] sm:$0xff]  ;;  %v322_v39 = vunpack.c.h.s8.bf16 %v287_v33 }
  0x1d   : > { %v3088_v26 = vld [vmem:[%s3954_s1 + $0x8] sm:$0xff]   ;;  %v3092_v30 = vld [vmem:[%s3954_s1] sm:$0xff]   ;;  %v314_v41 = vunpack.c.l.s8.bf16 %v286_v38  ;;  %v3094_v42 = vld [vmem:[%s3954_s1 + $0x178] sm:$0xff]   ;;  %v321_v50 = vunpack.c.h.s8.bf16 %v286_v38 }
  0x1e   : > { %2627 = vmatpush3.bf16.msra.mxu0 %v3072_v10  ;;  %v3089_v27 = vld [vmem:[%s3954_s1 + $0x88] sm:$0xff]   ;;  %v3093_v31 = vld [vmem:[%s3954_s1 + $0x80] sm:$0xff]   ;;  %921 = vmatprep.mubr.bf16.mxu1 %v315_v37  ;;  %v3095_v43 = vld [vmem:[%s3954_s1 + $0x138] sm:$0xff]  }
  0x1f   : > { %2691 = vmatpush3.bf16.msra.mxu1 %v3073_v11  ;;  %2628 = vmatprep.subr.bf16.mxu0 %v3074_v12  ;;  %v285_v32 = vld [vmem:[%s3365_s22 + $0x8] sm:$0xff]  ;;  %v284_v34 = vld [vmem:[%s3365_s22] sm:$0xff]  ;;  %v3096_v44 = vld [vmem:[%s3954_s1 + $0x170] sm:$0xff]  }
  0x20   : > { %2692 = vmatprep.subr.bf16.mxu1 %v3075_v13  ;;  %v313_v35 = vunpack.c.l.s8.bf16 %v285_v32  ;;  %v320_v36 = vunpack.c.h.s8.bf16 %v285_v32  ;;  %v312_v40 = vunpack.c.l.s8.bf16 %v284_v34  ;;  %v3097_v45 = vld [vmem:[%s3954_s1 + $0x130] sm:$0xff]   ;;  %v292_v46 = vld [vmem:[%s3365_s22 + $0x40] sm:$0xff]  ;;  %v3098_v48 = vld [vmem:[%s3954_s1 + $0x168] sm:$0xff]   ;;  %v319_v49 = vunpack.c.h.s8.bf16 %v284_v34 }
  0x21   : > { %v294_v47 = vld [vmem:[%s3365_s22 + $0x50] sm:$0xff]  ;;  %v327_v51 = vunpack.c.l.s8.bf16 %v292_v46  ;;  %v3099_v53 = vld [vmem:[%s3954_s1 + $0x128] sm:$0xff]   ;;  %v3100_v54 = vld [vmem:[%s3954_s1 + $0x160] sm:$0xff]   ;;  %v334_v61 = vunpack.c.h.s8.bf16 %v292_v46 }
  0x22   : > { %2629 = vmatpush3.bf16.msra.mxu0 %v3076_v14  ;;  %824 = vmatprep.mubr.bf16.mxu0 %v313_v35  ;;  %v329_v52 = vunpack.c.l.s8.bf16 %v294_v47  ;;  %v291_v55 = vld [vmem:[%s3365_s22 + $0x38] sm:$0xff]  ;;  %v293_v56 = vld [vmem:[%s3365_s22 + $0x48] sm:$0xff]  ;;  %v3101_v57 = vld [vmem:[%s3954_s1 + $0x120] sm:$0xff]   ;;  %v336_v62 = vunpack.c.h.s8.bf16 %v294_v47 }
  0x23   : > { %2693 = vmatpush3.bf16.msra.mxu1 %v3077_v15  ;;  %2630 = vmatprep.subr.bf16.mxu0 %v3078_v16  ;;  %v3102_v58 = vld [vmem:[%s3954_s1 + $0x158] sm:$0xff]   ;;  %v326_v59 = vunpack.c.l.s8.bf16 %v291_v55  ;;  %v328_v60 = vunpack.c.l.s8.bf16 %v293_v56  ;;  %v3104_v0 = vld [vmem:[%s3954_s1 + $0x150] sm:$0xff]   ;;  %v301_v2 = vld [vmem:[%s3365_s22 + $0x88] sm:$0xff]  ;;  %v333_v5 = vunpack.c.h.s8.bf16 %v291_v55  ;;  %v335_v6 = vunpack.c.h.s8.bf16 %v293_v56 }
  0x24   : > { %2694 = vmatprep.subr.bf16.mxu1 %v3079_v17  ;;  %v3103_v63 = vld [vmem:[%s3954_s1 + $0x118] sm:$0xff]   ;;  %v3105_v3 = vld [vmem:[%s3954_s1 + $0x110] sm:$0xff]   ;;  %v3106_v4 = vld [vmem:[%s3954_s1 + $0x148] sm:$0xff]   ;;  %v343_v8 = vunpack.c.l.s8.bf16 %v301_v2  ;;  %v350_v17 = vunpack.c.h.s8.bf16 %v301_v2 }
  0x25   : > { %v299_v1 = vld [vmem:[%s3365_s22 + $0x78] sm:$0xff]  ;;  %v3107_v9 = vld [vmem:[%s3954_s1 + $0x108] sm:$0xff]   ;;  %v3108_v10 = vld [vmem:[%s3954_s1 + $0x140] sm:$0xff]  }
  0x26   : > { %2631 = vmatpush3.bf16.msra.mxu0 %v3080_v18  ;;  %v341_v7 = vunpack.c.l.s8.bf16 %v299_v1  ;;  %v298_v11 = vld [vmem:[%s3365_s22 + $0x70] sm:$0xff]  ;;  %v300_v12 = vld [vmem:[%s3365_s22 + $0x80] sm:$0xff]  ;;  %v348_v16 = vunpack.c.h.s8.bf16 %v299_v1  ;;  %v309_v38 = vld [vmem:[%s3365_s22 + $0xc8] sm:$0xff] }
  0x27   : > { %2695 = vmatpush3.bf16.msra.mxu1 %v3081_v19  ;;  %2632 = vmatprep.subr.bf16.mxu0 %v3082_v20  ;;  %v3109_v13 = vld [vmem:[%s3954_s1 + $0x100] sm:$0xff]   ;;  %v340_v14 = vunpack.c.l.s8.bf16 %v298_v11  ;;  %v342_v15 = vunpack.c.l.s8.bf16 %v300_v12  ;;  %v306_v19 = vld [vmem:[%s3365_s22 + $0xb0] sm:$0xff]  ;;  %v365_v46 = vunpack.c.h.s8.bf16 %v309_v38  ;;  %v303_v55 = vld [vmem:[%s3365_s22 + $0x98] sm:$0xff] }
  0x28   : > { %2696 = vmatprep.subr.bf16.mxu1 %v3083_v21  ;;  %v3110_v18 = vld [vmem:[%s3954_s1 + $0x180] sm:$0xff]   ;;  %v347_v21 = vunpack.c.h.s8.bf16 %v298_v11  ;;  %v310_v32 = vld [vmem:[%s3365_s22 + $0xd0] sm:$0xff]  ;;  %v352_v1 = vunpack.c.h.s8.bf16 %v303_v55 }
  0x29   : > { %v308_v20 = vld [vmem:[%s3365_s22 + $0xc0] sm:$0xff] }
  0x2a   : > { %2633 = vmatpush3.bf16.msra.mxu0 %v3084_v22  ;;  %v349_v22 = vunpack.c.h.s8.bf16 %v300_v12  ;;  %v288_v37 = vld [vmem:[%s3365_s22 + $0x20] sm:$0xff] }
  0x2b   : > { %2697 = vmatpush3.bf16.msra.mxu1 %v3085_v23  ;;  %2634 = vmatprep.subr.bf16.mxu0 %v3086_v24  ;;  %v355_v23 = vunpack.c.l.s8.bf16 %v306_v19  ;;  %v357_v24 = vunpack.c.l.s8.bf16 %v308_v20  ;;  %v304_v56 = vld [vmem:[%s3365_s22 + $0xa0] sm:$0xff] }
  0x2c   : > { %2698 = vmatprep.subr.bf16.mxu1 %v3087_v25  ;;  %v305_v25 = vld [vmem:[%s3365_s22 + $0xa8] sm:$0xff] }
  0x2d   : > { %v361_v33 = vunpack.c.h.s8.bf16 %v305_v25 }
  0x2e   : > { %2635 = vmatpush3.bf16.msra.mxu0 %v3088_v26  ;;  %v307_v26 = vld [vmem:[%s3365_s22 + $0xb8] sm:$0xff] }
  0x2f   : > { %2699 = vmatpush3.bf16.msra.mxu1 %v3089_v27  ;;  %2636 = vmatprep.subr.bf16.mxu0 %v3090_v28  ;;  %v354_v27 = vunpack.c.l.s8.bf16 %v305_v25  ;;  %v356_v28 = vunpack.c.l.s8.bf16 %v307_v26  ;;  %v363_v34 = vunpack.c.h.s8.bf16 %v307_v26 }
  0x30   : > { %2700 = vmatprep.subr.bf16.mxu1 %v3091_v29  ;;  %v362_v29 = vunpack.c.h.s8.bf16 %v306_v19 }
  0x32   : > { %2637 = vmatpush3.bf16.msra.mxu0 %v3092_v30  ;;  %v364_v30 = vunpack.c.h.s8.bf16 %v308_v20 }
  0x33   : > { %2701 = vmatpush3.bf16.msra.mxu1 %v3093_v31  ;;  %2750 = vmatprep.subr.bf16.mxu0 %v3094_v42  ;;  %v289_v31 = vld [vmem:[%s3365_s22 + $0x28] sm:$0xff] }
  0x34   : > { %3003 = vmatprep.subr.bf16.mxu1 %v3094_v42  ;;  %v317_v35 = vunpack.c.l.s8.bf16 %v289_v31  ;;  %v366_v42 = vunpack.c.h.s8.bf16 %v310_v32 }
  0x35   : > { %825 = vmatmul.mubr.bf16.vlgmr.msra.gmra.mxu0 %v312_v40  ;;  %v358_v40 = vunpack.c.l.s8.bf16 %v309_v38 }
  0x36   : > { %922 = vmatmul.mubr.bf16.vlgmr.msra.gmra.mxu1 %v314_v41  ;;  %832 = vmatprep.mubr.bf16.mxu0 %v320_v36  ;;  %v359_v36 = vunpack.c.l.s8.bf16 %v310_v32  ;;  %v324_v41 = vunpack.c.h.s8.bf16 %v289_v31 }
  0x37   : > { %2751 = vmatpush3.bf16.msra.mxu0 %v3095_v43  ;;  %929 = vmatprep.mubr.bf16.mxu1 %v322_v39  ;;  %v316_v39 = vunpack.c.l.s8.bf16 %v288_v37 }
  0x38   : > { %2752 = vmatprep.subr.bf16.mxu0 %v3096_v44  ;;  %3011 = vmatpush3.bf16.msra.mxu1 %v3095_v43  ;;  %v296_v43 = vld [vmem:[%s3365_s22 + $0x60] sm:$0xff] }
  0x39   : > { %3004 = vmatprep.subr.bf16.mxu1 %v3096_v44  ;;  %v290_v44 = vld [vmem:[%s3365_s22 + $0x30] sm:$0xff]  ;;  %v331_v47 = vunpack.c.l.s8.bf16 %v296_v43 }
  0x3b   : > { %2753 = vmatpush3.bf16.msra.mxu0 %v3097_v45 }
  0x3c   : > { %2754 = vmatprep.subr.bf16.mxu0 %v3098_v48  ;;  %3012 = vmatpush3.bf16.msra.mxu1 %v3097_v45  ;;  %v323_v45 = vunpack.c.h.s8.bf16 %v288_v37 }
  0x3d   : > { %833 = vmatmul.mubr.bf16.gmra.mxu0 %v319_v49  ;;  %3005 = vmatprep.subr.bf16.mxu1 %v3098_v48  ;;  %v318_v48 = vunpack.c.l.s8.bf16 %v290_v44  ;;  %v295_v49 = vld [vmem:[%s3365_s22 + $0x58] sm:$0xff] }
  0x3e   : > { %930 = vmatmul.mubr.bf16.gmra.mxu1 %v321_v50  ;;  %840 = vmatprep.mubr.bf16.mxu0 %v327_v51  ;;  %v297_v50 = vld [vmem:[%s3365_s22 + $0x68] sm:$0xff]  ;;  %v325_v51 = vunpack.c.h.s8.bf16 %v290_v44 }
  0x3f   : > { %937 = vmatprep.mubr.bf16.mxu1 %v329_v52  ;;  %2755 = vmatpush3.bf16.msra.mxu0 %v3099_v53  ;;  %v330_v52 = vunpack.c.l.s8.bf16 %v295_v49 }
  0x40   : > { %2756 = vmatprep.subr.bf16.mxu0 %v3100_v54  ;;  %3013 = vmatpush3.bf16.msra.mxu1 %v3099_v53  ;;  %v338_v53 = vunpack.c.h.s8.bf16 %v296_v43 }
  0x41   : > { %3006 = vmatprep.subr.bf16.mxu1 %v3100_v54  ;;  %v332_v54 = vunpack.c.l.s8.bf16 %v297_v50 }
  0x43   : > { %2757 = vmatpush3.bf16.msra.mxu0 %v3101_v57 }
  0x44   : > { %2758 = vmatprep.subr.bf16.mxu0 %v3102_v58  ;;  %3014 = vmatpush3.bf16.msra.mxu1 %v3101_v57  ;;  %v337_v57 = vunpack.c.h.s8.bf16 %v295_v49 }
  0x45   : > { %841 = vmatmul.mubr.bf16.gmra.mxu0 %v326_v59  ;;  %3007 = vmatprep.subr.bf16.mxu1 %v3102_v58  ;;  %v339_v58 = vunpack.c.h.s8.bf16 %v297_v50  ;;  %v345_v59 = vunpack.c.l.s8.bf16 %v303_v55 }
  0x46   : > { %938 = vmatmul.mubr.bf16.gmra.mxu1 %v328_v60  ;;  %848 = vmatprep.mubr.bf16.mxu0 %v334_v61  ;;  %v346_v60 = vunpack.c.l.s8.bf16 %v304_v56  ;;  %v302_v61 = vld [vmem:[%s3365_s22 + $0x90] sm:$0xff] }
  0x47   : > { %945 = vmatprep.mubr.bf16.mxu1 %v336_v62  ;;  %2759 = vmatpush3.bf16.msra.mxu0 %v3103_v63  ;;  %v311_v62 = vld [vmem:[%s3365_s22 + $0xd8] sm:$0xff]  ;;  %s2338_s22 = sshll.u32 %s3892_s21, 4  ;;  %s3907_s22 = int_to_ptr.vmem [resolvable:$true] %s2338_s22 }
  0x48   : > { %2760 = vmatprep.subr.bf16.mxu0 %v3104_v0  ;;  %3015 = vmatpush3.bf16.msra.mxu1 %v3103_v63  ;;  %v344_v63 = vunpack.c.l.s8.bf16 %v302_v61  ;;  %v360_v2 = vunpack.c.l.s8.bf16 %v311_v62  ;;  %s3117_s8 = scalar_lea.vmem %s3907_s22, 1024  ;;  %p3124_p0 = scmp.lt.s32.totalorder %s3907_s22, %s3122_s16 }
  0x49   : > { %3008 = vmatprep.subr.bf16.mxu1 %v3104_v0  ;;  %v353_v0 = vunpack.c.h.s8.bf16 %v304_v56  ;;  %p3118_p11 = scmp.ne.s32.totalorder %s3907_s22, %s3117_s8  ;;  %p3125_p1 = scmp.lt.s32.totalorder %s3123_s17, %s3117_s8 }
  0x4b   : > { %2761 = vmatpush3.bf16.msra.mxu0 %v3105_v3  ;;  %p3119_p12 = pnand %p3118_p11, %p3261_p5  ;;  %p3126_p2 = por %p3125_p1, %p3124_p0 }
  0x4c   : > { %2762 = vmatprep.subr.bf16.mxu0 %v3106_v4  ;;  %3016 = vmatpush3.bf16.msra.mxu1 %v3105_v3  ;;  %v351_v3 = vunpack.c.h.s8.bf16 %v302_v61 }
  0x4d   : > { %849 = vmatmul.mubr.bf16.gmra.mxu0 %v333_v5  ;;  %3009 = vmatprep.subr.bf16.mxu1 %v3106_v4  ;;  %v367_v4 = vunpack.c.h.s8.bf16 %v311_v62  ;;  %v3111_v5 = vld [vmem:[%s3955_s2] sm:$0xff]   ;;  %p3120_p13 = pneg %p3119_p12 }
  0x4e   : > { %946 = vmatmul.mubr.bf16.gmra.mxu1 %v335_v6  ;;  %856 = vmatprep.mubr.bf16.mxu0 %v341_v7 }
  0x4f   : > { %953 = vmatprep.mubr.bf16.mxu1 %v343_v8  ;;  %2763 = vmatpush3.bf16.msra.mxu0 %v3107_v9  ;;  %v3112_v8 = vld [vmem:[%s3955_s2 + $0x8] sm:$0xff]   ;;  %p3127_p3 = pnand %p3126_p2, %p3120_p13 }
  0x50   : > { %2764 = vmatprep.subr.bf16.mxu0 %v3108_v10  ;;  %3017 = vmatpush3.bf16.msra.mxu1 %v3107_v9  ;;  %v3469_v9 = vld [vmem:[%s3957_s4] ss:$0 sm:$0xff] }
  0x51   : > { %3010 = vmatprep.subr.bf16.mxu1 %v3108_v10 }
  0x53   : > { %2765 = vmatpush3.bf16.msra.mxu0 %v3109_v13 }
  0x54   : > { %3018 = vmatpush3.bf16.msra.mxu1 %v3109_v13  ;;  %2913 = vmatprep.subr.bf16.mxu0 %v3112_v8 }
  0x55   : > { %857 = vmatmul.mubr.bf16.gmra.mxu0 %v340_v14  ;;  %2877 = vmatprep.subr.bf16.mxu1 %v3110_v18 }
  0x56   : > { %954 = vmatmul.mubr.bf16.gmra.mxu1 %v342_v15  ;;  %864 = vmatprep.mubr.bf16.mxu0 %v348_v16 }
  0x57   : > { %961 = vmatprep.mubr.bf16.mxu1 %v350_v17 }
  0x5d   : > { %865 = vmatmul.mubr.bf16.gmra.mxu0 %v347_v21 }
  0x5e   : > { %962 = vmatmul.mubr.bf16.gmra.mxu1 %v349_v22  ;;  %872 = vmatprep.mubr.bf16.mxu0 %v355_v23 }
  0x5f   : > { %969 = vmatprep.mubr.bf16.mxu1 %v357_v24 }
  0x65   : > { %873 = vmatmul.mubr.bf16.gmra.mxu0 %v354_v27 }
  0x66   : > { %970 = vmatmul.mubr.bf16.gmra.mxu1 %v356_v28  ;;  %880 = vmatprep.mubr.bf16.mxu0 %v362_v29 }
  0x67   : > { %977 = vmatprep.mubr.bf16.mxu1 %v364_v30 }
  0x6d   : > { %881 = vmatmul.mubr.bf16.gmra.mxu0 %v361_v33 }
  0x6e   : > { %978 = vmatmul.mubr.bf16.gmra.mxu1 %v363_v34  ;;  %1018 = vmatprep.mubr.bf16.mxu0 %v317_v35 }
  0x6f   : > { %1066 = vmatprep.mubr.bf16.mxu1 %v359_v36 }
  0x75   : > { %1019 = vmatmul.mubr.bf16.vlgmr.msra.gmra.mxu0 %v316_v39 }
  0x76   : > { %1067 = vmatmul.mubr.bf16.vlgmr.msra.gmra.mxu1 %v358_v40  ;;  %1026 = vmatprep.mubr.bf16.mxu0 %v324_v41 }
  0x77   : > { %1074 = vmatprep.mubr.bf16.mxu1 %v366_v42  ;;  %2878 = vmatpush3.bf16.msra.mxu1 %v3110_v18 }
  0x78   : > { %2895 = vmatprep.subr.bf16.mxu1 %v3111_v5  ;;  %2914 = vmatpush3.bf16.msra.mxu0 %v3112_v8 }
  0x7d   : > { %1027 = vmatmul.mubr.bf16.gmra.mxu0 %v323_v45 }
  0x7e   : > { %1075 = vmatmul.mubr.bf16.gmra.mxu1 %v365_v46  ;;  %1034 = vmatprep.mubr.bf16.mxu0 %v331_v47 }
  0x7f   : > { %2879 = vmatprep.mubr.msk.bf16.mxu1 %vm767_vm0, %v318_v48 }
  0x85   : > { %1035 = vmatmul.mubr.bf16.gmra.mxu0 %v330_v52 }
  0x86   : > { %2880 = vmatmul.mubr.msk.bf16.vlgmr.msra.gmra.mxu1 %vm767_vm0, %v325_v51  ;;  %1042 = vmatprep.mubr.bf16.mxu0 %v338_v53 }
  0x87   : > { %2883 = vmatprep.mubr.msk.bf16.mxu1 %vm767_vm0, %v332_v54  ;;  %2896 = vmatpush3.bf16.msra.mxu1 %v3111_v5 }
  0x8d   : > { %1043 = vmatmul.mubr.bf16.gmra.mxu0 %v337_v57 }
  0x8e   : > { %2884 = vmatmul.mubr.msk.bf16.gmra.mxu1 %vm767_vm0, %v339_v58  ;;  %1050 = vmatprep.mubr.bf16.mxu0 %v345_v59 }
  0x8f   : > { %2887 = vmatprep.mubr.msk.bf16.mxu1 %vm767_vm0, %v346_v60 }
  0x95   : > { %1051 = vmatmul.mubr.bf16.gmra.mxu0 %v344_v63 }
  0x96   : > { %2888 = vmatmul.mubr.msk.bf16.gmra.mxu1 %vm767_vm0, %v353_v0  ;;  %1058 = vmatprep.mubr.bf16.mxu0 %v352_v1 }
  0x97   : > { %2891 = vmatprep.mubr.msk.bf16.mxu1 %vm767_vm0, %v360_v2 }
  0x9d   : > { %1059 = vmatmul.mubr.bf16.gmra.mxu0 %v351_v3 }
  0x9e   : > { %2892 = vmatmul.mubr.msk.bf16.gmra.mxu1 %vm767_vm0, %v367_v4 }
  0xf5   : > { %v2638_v6 = vpop.f32.mrf.mxu0 }
  0xf6   : > { %v2702_v7 = vpop.f32.mrf.mxu1 }
  0xf7   : > { %v2639_v10 = vpop.f32.mrf.mxu0 }
  0xf8   : > { %v2703_v11 = vpop.f32.mrf.mxu1  ;;  %v2640_v12 = vadd.f32 %v2639_v10, %v2638_v6 }
  0xf9   : > { %v2704_v13 = vadd.f32 %v2703_v11, %v2702_v7  ;;  %v2641_v14 = vpop.f32.mrf.mxu0 }
  0xfa   : > { %v2705_v15 = vpop.f32.mrf.mxu1  ;;  %v827_v16 = vadd.f32 %v2640_v12, %v3469_v9 }
  0xfb   : > { %v2642_v17 = vpop.f32.mrf.mxu0 }
  0xfc   : > { %v2706_v18 = vpop.f32.mrf.mxu1  ;;  %v3472_v19 = vadd.f32 %v2704_v13, %v827_v16  ;;  %v2643_v20 = vadd.f32 %v2642_v17, %v2641_v14 }
  0xfd   : > { %v2707_v21 = vadd.f32 %v2706_v18, %v2705_v15  ;;  %v2644_v22 = vpop.f32.mrf.mxu0 }
  0xfe   : > { %v2708_v23 = vpop.f32.mrf.mxu1  ;;  %v830_v24 = vadd.f32 %v2643_v20, %v3469_v9 }
  0xff   : > { %v2645_v25 = vpop.f32.mrf.mxu0 }
 0x100   : > { %v2709_v26 = vpop.f32.mrf.mxu1  ;;  %v3475_v27 = vadd.f32 %v2707_v21, %v830_v24  ;;  %v2646_v28 = vadd.f32 %v2645_v25, %v2644_v22 }
 0x101   : > { %v2710_v29 = vadd.f32 %v2709_v26, %v2708_v23  ;;  %v2647_v30 = vpop.f32.mrf.mxu0 }
 0x102   : > { %v2711_v31 = vpop.f32.mrf.mxu1  ;;  %v835_v32 = vadd.f32 %v2646_v28, %v3469_v9 }
 0x103   : > { %v2648_v33 = vpop.f32.mrf.mxu0 }
 0x104   : > { %v2712_v34 = vpop.f32.mrf.mxu1  ;;  %v3478_v35 = vadd.f32 %v2710_v29, %v835_v32  ;;  %v2649_v36 = vadd.f32 %v2648_v33, %v2647_v30 }
 0x105   : > { %v2713_v37 = vadd.f32 %v2712_v34, %v2711_v31  ;;  %v2650_v38 = vpop.f32.mrf.mxu0 }
 0x106   : > { %v2714_v39 = vpop.f32.mrf.mxu1  ;;  %v838_v40 = vadd.f32 %v2649_v36, %v3469_v9 }
 0x107   : > { %v2651_v41 = vpop.f32.mrf.mxu0 }
 0x108   : > { %v2715_v42 = vpop.f32.mrf.mxu1  ;;  %v3481_v43 = vadd.f32 %v2713_v37, %v838_v40  ;;  %v2652_v44 = vadd.f32 %v2651_v41, %v2650_v38 }
 0x109   : > { %v2716_v45 = vadd.f32 %v2715_v42, %v2714_v39  ;;  %v2653_v46 = vpop.f32.mrf.mxu0 }
 0x10a   : > { %v2717_v47 = vpop.f32.mrf.mxu1  ;;  %v843_v48 = vadd.f32 %v2652_v44, %v3469_v9 }
 0x10b   : > { %v2654_v49 = vpop.f32.mrf.mxu0 }
 0x10c   : > { %v2718_v50 = vpop.f32.mrf.mxu1  ;;  %v3484_v51 = vadd.f32 %v2716_v45, %v843_v48  ;;  %v2655_v52 = vadd.f32 %v2654_v49, %v2653_v46 }
 0x10d   : > { %v2719_v53 = vadd.f32 %v2718_v50, %v2717_v47  ;;  %v2656_v54 = vpop.f32.mrf.mxu0 }
 0x10e   : > { %v2720_v55 = vpop.f32.mrf.mxu1  ;;  %v846_v56 = vadd.f32 %v2655_v52, %v3469_v9 }
 0x10f   : > { %v2657_v57 = vpop.f32.mrf.mxu0 }
 0x110   : > { %v2721_v58 = vpop.f32.mrf.mxu1  ;;  %v3487_v59 = vadd.f32 %v2719_v53, %v846_v56  ;;  %v2658_v60 = vadd.f32 %v2657_v57, %v2656_v54 }
 0x111   : > { %v2722_v61 = vadd.f32 %v2721_v58, %v2720_v55  ;;  %v3489_v62 = vpop.f32.mrf.mxu0 }
 0x112   : > { %v3491_v63 = vpop.f32.mrf.mxu1  ;;  %v851_v0 = vadd.f32 %v2658_v60, %v3469_v9 }
 0x113   : > { %v3494_v1 = vpop.f32.mrf.mxu0 }
 0x114   : > { %v3496_v2 = vpop.f32.mrf.mxu1  ;;  %v3498_v3 = vadd.f32 %v2722_v61, %v851_v0 }
 0x115   : > { %v2662_v4 = vpop.f32.mrf.mxu0 }
 0x116   : > { %v2726_v5 = vpop.f32.mrf.mxu1 }
 0x117   : > { %v2663_v6 = vpop.f32.mrf.mxu0 }
 0x118   : > { %v2727_v7 = vpop.f32.mrf.mxu1  ;;  %v2664_v8 = vadd.f32 %v2663_v6, %v2662_v4 }
 0x119   : > { %v2728_v10 = vadd.f32 %v2727_v7, %v2726_v5  ;;  %v3500_v11 = vpop.f32.mrf.mxu0 }
 0x11a   : > { %v3502_v12 = vpop.f32.mrf.mxu1  ;;  %v859_v13 = vadd.f32 %v2664_v8, %v3469_v9 }
 0x11b   : > { %v3505_v14 = vpop.f32.mrf.mxu0 }
 0x11c   : > { %v3507_v15 = vpop.f32.mrf.mxu1  ;;  %v3509_v16 = vadd.f32 %v2728_v10, %v859_v13 }
 0x11d   : > { %v2668_v17 = vpop.f32.mrf.mxu0 }
 0x11e   : > { %v2732_v18 = vpop.f32.mrf.mxu1 }
 0x11f   : > { %v2669_v20 = vpop.f32.mrf.mxu0 }
 0x120   : > { %v2733_v21 = vpop.f32.mrf.mxu1  ;;  %v2670_v22 = vadd.f32 %v2669_v20, %v2668_v17 }
 0x121   : > { %v2734_v23 = vadd.f32 %v2733_v21, %v2732_v18  ;;  %v3511_v24 = vpop.f32.mrf.mxu0 }
 0x122   : > { %v3513_v25 = vpop.f32.mrf.mxu1  ;;  %v867_v26 = vadd.f32 %v2670_v22, %v3469_v9 }
 0x123   : > { %v3516_v28 = vpop.f32.mrf.mxu0 }
 0x124   : > { %v3518_v29 = vpop.f32.mrf.mxu1  ;;  %v3520_v30 = vadd.f32 %v2734_v23, %v867_v26 }
 0x125   : > { %v3522_v31 = vpop.f32.mrf.mxu0 }
 0x126   : > { %v3524_v32 = vpop.f32.mrf.mxu1 }
 0x127   : > { %v3526_v33 = vpop.f32.mrf.mxu0 }
 0x128   : > { %v3528_v34 = vpop.f32.mrf.mxu1 }
 0x129   : > { %v3530_v36 = vpop.f32.mrf.mxu0 }
 0x12a   : > { %v3532_v37 = vpop.f32.mrf.mxu1 }
 0x12b   : > { %v3534_v38 = vpop.f32.mrf.mxu0 }
 0x12c   : > { %v3536_v39 = vpop.f32.mrf.mxu1 }
 0x12d   : > { %v3538_v40 = vpop.f32.mrf.mxu0 }
 0x12e   : > { %v3540_v41 = vpop.f32.mrf.mxu1 }
 0x12f   : > { %v3542_v42 = vpop.f32.mrf.mxu0 }
 0x130   : > { %v3544_v44 = vpop.f32.mrf.mxu1 }
 0x131   : > { %v3546_v45 = vpop.f32.mrf.mxu0 }
 0x132   : > { %v3548_v46 = vpop.f32.mrf.mxu1 }
 0x133   : > { %v3550_v47 = vpop.f32.mrf.mxu0 }
 0x134   : > { %v3552_v48 = vpop.f32.mrf.mxu1 }
 0x135   : > { %v2766_v49 = vpop.f32.mrf.mxu0 }
 0x136   : > { %v3554_v50 = vpop.f32.mrf.mxu1 }
 0x137   : > { %v2767_v52 = vpop.f32.mrf.mxu0 }
 0x138   : > { %v3556_v53 = vpop.f32.mrf.mxu1  ;;  %v2768_v7 = vadd.f32 %v2767_v52, %v2766_v49 }
 0x139   : > { %v2769_v54 = vpop.f32.mrf.mxu0 }
 0x13a   : > { %v3558_v55 = vpop.f32.mrf.mxu1  ;;  %v1021_v23 = vadd.f32 %v2768_v7, %v3472_v19 }
 0x13b   : > { %v2770_v56 = vpop.f32.mrf.mxu0 }
 0x13c   : > { %v3560_v57 = vpop.f32.mrf.mxu1  ;;  %v2771_v21 = vadd.f32 %v2770_v56, %v2769_v54  ;;  %v3179_v56 = vmov -1.0  }
 0x13d   : > { %v2772_v58 = vpop.f32.mrf.mxu0 }
 0x13e   : > { %v3562_v60 = vpop.f32.mrf.mxu1 }
 0x13f   : > { %3963 = vst [vmem:[#allocation5_spill] sm:$0xff] %v3562_v60  ;;  %v2773_v61 = vpop.f32.mrf.mxu0 }
 0x140   : > { %v3564_v0 = vpop.f32.mrf.mxu1  ;;  %v2774_v4 = vadd.f32 %v2773_v61, %v2772_v58 }
 0x141   : > { %3964 = vst [vmem:[#allocation6_spill] sm:$0xff] %v3564_v0  ;;  %v2775_v5 = vpop.f32.mrf.mxu0 }
 0x142   : > { %v3566_v6 = vpop.f32.mrf.mxu1  ;;  %v1029_v17 = vadd.f32 %v2774_v4, %v3478_v35  ;;  %v2661_v35 = vadd.f32 %v3494_v1, %v3489_v62  ;;  %v2725_v62 = vadd.f32 %v3496_v2, %v3491_v63 }
 0x143   : > { %3965 = vst [vmem:[#allocation7_spill] sm:$0xff] %v3566_v6  ;;  %v2776_v8 = vpop.f32.mrf.mxu0 }
 0x144   : > { %v3568_v10 = vpop.f32.mrf.mxu1  ;;  %v2777_v13 = vadd.f32 %v2776_v8, %v2775_v5  ;;  %v1024_v5 = vadd.f32 %v2771_v21, %v3475_v27 }
 0x145   : > { %v2778_v18 = vpop.f32.mrf.mxu0 }
 0x146   : > { %v2881_v20 = vpop.f32.mrf.mxu1  ;;  %v1032_v58 = vadd.f32 %v2777_v13, %v3481_v43 }
 0x147   : > { %v1126_v22 = vadd.f32 %v2881_v20, %v1029_v17  ;;  %v2779_v26 = vpop.f32.mrf.mxu0 }
 0x148   : > { %v1117_v60 = vpop.f32.mrf.mxu1  ;;  %v2780_v49 = vadd.f32 %v2779_v26, %v2778_v18 }
 0x149   : > { %v1118_v0 = vadd.f32 %v1117_v60, %v1021_v23  ;;  %v2781_v61 = vpop.f32.mrf.mxu0  ;;  %vm1182_vm1 = vcmp.ge.f32.partialorder %v1126_v22, 0.0 }
 0x14a   : > { %v2882_v6 = vpop.f32.mrf.mxu1  ;;  %v1198_v60 = vsel %vm1182_vm1, 1.0, %v3179_v56  ;;  %v1037_v27 = vadd.f32 %v2780_v49, %v3484_v51 }
 0x14b   : > { %v1129_v52 = vadd.f32 %v2882_v6, %v1032_v58  ;;  %v2782_v4 = vpop.f32.mrf.mxu0  ;;  %vm1180_vm2 = vcmp.ge.f32.partialorder %v1118_v0, 0.0  ;;  %v854_v6 = vadd.f32 %v2661_v35, %v3469_v9 }
 0x14c   : > { %v1120_v54 = vpop.f32.mrf.mxu1  ;;  %v2783_v17 = vadd.f32 %v2782_v4, %v2781_v61  ;;  %v1196_v1 = vsel %vm1180_vm2, 1.0, %v3179_v56  ;;  %v2667_v61 = vadd.f32 %v3505_v14, %v3500_v11 }
 0x14d   : > { %vm1183_vm3 = vcmp.ge.f32.partialorder %v1129_v52, 0.0  ;;  %v1121_v19 = vadd.f32 %v1120_v54, %v1024_v5  ;;  %v2784_v7 = vpop.f32.mrf.mxu0  ;;  %v951_v2 = vadd.f32 %v2725_v62, %v854_v6  ;;  %v2676_v6 = vadd.f32 %v3526_v33, %v3522_v31 }
 0x14e   : > { %v1199_v43 = vsel %vm1183_vm3, 1.0, %v3179_v56  ;;  %v2885_v8 = vpop.f32.mrf.mxu1  ;;  %v1040_v63 = vadd.f32 %v2783_v17, %v3487_v59  ;;  %v862_v11 = vadd.f32 %v2667_v61, %v3469_v9  ;;  %v2673_v59 = vadd.f32 %v3516_v28, %v3511_v24 }
 0x14f   : > { %v1213_v13 = vpack.c.bf16 %v1199_v43, %v1198_v60  ;;  %vm1181_vm4 = vcmp.ge.f32.partialorder %v1121_v19, 0.0  ;;  %v2785_v18 = vpop.f32.mrf.mxu0  ;;  %v2685_v61 = vadd.f32 %v3550_v47, %v3546_v45  ;;  %v2746_v45 = vadd.f32 %v3544_v44, %v3540_v41 }
 0x150   : > { %v1197_v0 = vsel %vm1181_vm4, 1.0, %v3179_v56  ;;  %v1133_v20 = vpop.f32.mrf.mxu1  ;;  %v2786_v22 = vadd.f32 %v2785_v18, %v2784_v7  ;;  %v870_v28 = vadd.f32 %v2673_v59, %v3469_v9 }
 0x151   : > { %v1212_v21 = vpack.c.bf16 %v1197_v0, %v1196_v1  ;;  %v1134_v23 = vadd.f32 %v1133_v20, %v1037_v27  ;;  %v2787_v26 = vpop.f32.mrf.mxu0  ;;  %v2737_v0 = vadd.f32 %v3518_v29, %v3513_v25  ;;  %v2682_v25 = vadd.f32 %v3542_v42, %v3538_v40 }
 0x152   : > { %v2886_v58 = vpop.f32.mrf.mxu1  ;;  %v1045_v51 = vadd.f32 %v2786_v22, %v3498_v3  ;;  %v2731_v3 = vadd.f32 %v3507_v15, %v3502_v12  ;;  %v2679_v12 = vadd.f32 %v3534_v38, %v3530_v36  ;;  %v2740_v36 = vadd.f32 %v3528_v34, %v3524_v32 }
 0x153   : > { %2897 = vmatprep.mubr.msk.bf16.mxu1 %vm767_vm0, %v1212_v21  ;;  %v2788_v49 = vpop.f32.mrf.mxu0  ;;  %vm1184_vm5 = vcmp.ge.f32.partialorder %v1134_v23, 0.0  ;;  %v2804_v32 = vadd.f32 %v3556_v53, %v3554_v50  ;;  %v2807_v34 = vadd.f32 %v3560_v57, %v3558_v55  ;;  %v886_v50 = vadd.f32 %v2685_v61, %v3469_v9 }
 0x154   : > { %v1136_v52 = vpop.f32.mrf.mxu1  ;;  %2898 = vmatmul.mubr.msk.bf16.vlgmr.msra.gmra.mxu1 %vm767_vm0, %v1213_v13  ;;  %v1142_v5 = vadd.f32 %v2885_v8, %v1045_v51  ;;  %v2789_v35 = vadd.f32 %v2788_v49, %v2787_v26  ;;  %v1200_v60 = vsel %vm1184_vm5, 1.0, %v3179_v56  ;;  %v959_v1 = vadd.f32 %v2731_v3, %v862_v11 }
 0x155   : > { %v1137_v4 = vadd.f32 %v1136_v52, %v1040_v63  ;;  %v2790_v54 = vpop.f32.mrf.mxu0  ;;  %v878_v23 = vadd.f32 %v2679_v12, %v3469_v9  ;;  %v2743_v26 = vadd.f32 %v3536_v39, %v3532_v37  ;;  %v967_v37 = vadd.f32 %v2737_v0, %v870_v28 }
 0x156   : > { %v3590_v19 = vpop.f32.mrf.mxu1  ;;  %v1048_v14 = vadd.f32 %v2789_v35, %v951_v2  ;;  %vm1186_vm7 = vcmp.ge.f32.partialorder %v1142_v5, 0.0  ;;  %v883_v52 = vadd.f32 %v2682_v25, %v3469_v9  ;;  %v2749_v53 = vadd.f32 %v3552_v48, %v3548_v46 }
 0x157   : > { %vm1185_vm6 = vcmp.ge.f32.partialorder %v1137_v4, 0.0  ;;  %v2791_v7 = vpop.f32.mrf.mxu0  ;;  %v1202_v18 = vsel %vm1186_vm7, 1.0, %v3179_v56  ;;  %v975_v49 = vadd.f32 %v2743_v26, %v878_v23 }
 0x158   : > { %v1201_v43 = vsel %vm1185_vm6, 1.0, %v3179_v56  ;;  %v1149_v8 = vpop.f32.mrf.mxu1  ;;  %v1145_v13 = vadd.f32 %v2886_v58, %v1048_v14  ;;  %v2792_v27 = vadd.f32 %v2791_v7, %v2790_v54  ;;  %v3966_v14 = vld [vmem:[#allocation7_spill] sm:$0xff]  ;;  %v983_v48 = vadd.f32 %v2749_v53, %v886_v50 }
 0x159   : > { %v1214_v17 = vpack.c.bf16 %v1201_v43, %v1200_v60  ;;  %v2793_v15 = vpop.f32.mrf.mxu0  ;;  %v1072_v11 = vadd.f32 %v2807_v34, %v975_v49  ;;  %v2813_v41 = vadd.f32 %v3568_v10, %v3966_v14  ;;  %v3967_v43 = vld [vmem:[#allocation5_spill] sm:$0xff] }
 0x15a   : > { %v2890_v62 = vpop.f32.mrf.mxu1  ;;  %vm1187_vm8 = vcmp.ge.f32.partialorder %v1145_v13, 0.0  ;;  %v1053_v24 = vadd.f32 %v2792_v27, %v3509_v16  ;;  %v875_v16 = vadd.f32 %v2676_v6, %v3469_v9  ;;  %v980_v13 = vadd.f32 %v2746_v45, %v883_v52 }
 0x15b   : > { %2901 = vmatprep.mubr.msk.bf16.mxu1 %vm767_vm0, %v1214_v17  ;;  %v1203_v31 = vsel %vm1187_vm8, 1.0, %v3179_v56  ;;  %v2794_v33 = vpop.f32.mrf.mxu0  ;;  %v1080_v17 = vadd.f32 %v2813_v41, %v983_v48 }
 0x15c   : > { %v1152_v20 = vpop.f32.mrf.mxu1  ;;  %v1215_v38 = vpack.c.bf16 %v1203_v31, %v1202_v18  ;;  %v1150_v21 = vadd.f32 %v1149_v8, %v1053_v24  ;;  %v2795_v22 = vadd.f32 %v2794_v33, %v2793_v15  ;;  %v972_v42 = vadd.f32 %v2740_v36, %v875_v16  ;;  %v3113_v33 = vld [vmem:[%s3955_s2 + $0x10] sm:$0xff]   ;;  %v3655_v36 = vld [vmem:[%s3958_s5] ss:$0 sm:$0xff] }
 0x15d   : > { %v2796_v29 = vpop.f32.mrf.mxu0  ;;  %2931 = vmatprep.subr.bf16.mxu1 %v3113_v33 }
 0x15e   : > { %v2893_v58 = vpop.f32.mrf.mxu1  ;;  %v1056_v51 = vadd.f32 %v2795_v22, %v959_v1  ;;  %2902 = vmatmul.mubr.msk.bf16.gmra.mxu1 %vm767_vm0, %v1215_v38  ;;  %vm1188_vm9 = vcmp.ge.f32.partialorder %v1150_v21, 0.0  ;;  %v1069_v4 = vadd.f32 %v2804_v32, %v972_v42 }
 0x15f   : > { %v2797_v63 = vpop.f32.mrf.mxu0  ;;  %v1204_v57 = vsel %vm1188_vm9, 1.0, %v3179_v56  ;;  %2932 = vmatpush3.bf16.msra.mxu1 %v3113_v33 }
 0x160   : > { %v1165_v2 = vpop.f32.mrf.mxu1  ;;  %v1153_v39 = vadd.f32 %v1152_v20, %v1056_v51  ;;  %v2798_v40 = vadd.f32 %v2797_v63, %v2796_v29 }
 0x161   : > { %v2799_v47 = vpop.f32.mrf.mxu0  ;;  %v1166_v60 = vadd.f32 %v1165_v2, %v1069_v4 }
 0x162   : > { %v2894_v5 = vpop.f32.mrf.mxu1  ;;  %vm1189_vm10 = vcmp.ge.f32.partialorder %v1153_v39, 0.0  ;;  %v1061_v55 = vadd.f32 %v2798_v40, %v3520_v30  ;;  %v3968_v30 = vld [vmem:[#allocation6_spill] sm:$0xff] }
 0x163   : > { %v1205_v35 = vsel %vm1189_vm10, 1.0, %v3179_v56  ;;  %v2800_v54 = vpop.f32.mrf.mxu0  ;;  %v2810_v7 = vadd.f32 %v3968_v30, %v3967_v43  ;;  %vm1192_vm13 = vcmp.ge.f32.partialorder %v1166_v60, 0.0  ;;  %v1177_v6 = vadd.f32 %v2894_v5, %v1080_v17 }
 0x164   : > { %v1168_v3 = vpop.f32.mrf.mxu1  ;;  %v1216_v44 = vpack.c.bf16 %v1205_v35, %v1204_v57  ;;  %v1158_v9 = vadd.f32 %v3590_v19, %v1061_v55  ;;  %v2801_v59 = vadd.f32 %v2800_v54, %v2799_v47  ;;  %v1208_v24 = vsel %vm1192_vm13, 1.0, %v3179_v56 }
 0x165   : > { %v1169_v46 = vadd.f32 %v1168_v3, %v1072_v11  ;;  %v1077_v10 = vadd.f32 %v2810_v7, %v980_v13  ;;  %vm1195_vm15 = vcmp.ge.f32.partialorder %v1177_v6, 0.0 }
 0x166   : > { %v1064_v8 = vadd.f32 %v2801_v59, %v967_v37  ;;  %2905 = vmatprep.mubr.msk.bf16.mxu1 %vm767_vm0, %v1216_v44  ;;  %vm1190_vm12 = vcmp.ge.f32.partialorder %v1158_v9, 0.0 }
 0x167   : > { %vm1193_vm11 = vcmp.ge.f32.partialorder %v1169_v46, 0.0  ;;  %v1206_v12 = vsel %vm1190_vm12, 1.0, %v3179_v56  ;;  %v1174_v1 = vadd.f32 %v2893_v58, %v1077_v10 }
 0x168   : > { %v1161_v27 = vadd.f32 %v2890_v62, %v1064_v8  ;;  %v1209_v19 = vsel %vm1193_vm11, 1.0, %v3179_v56  ;;  %v1211_v62 = vsel %vm1195_vm15, 1.0, %v3179_v56 }
 0x169   : > { %v1218_v0 = vpack.c.bf16 %v1209_v19, %v1208_v24  ;;  %vm1194_vm1 = vcmp.ge.f32.partialorder %v1174_v1, 0.0 }
 0x16a   : > { %vm1191_vm14 = vcmp.ge.f32.partialorder %v1161_v27, 0.0  ;;  %v1210_v18 = vsel %vm1194_vm1, 1.0, %v3179_v56 }
 0x16b   : > { %v1207_v15 = vsel %vm1191_vm14, 1.0, %v3179_v56  ;;  %v1219_v31 = vpack.c.bf16 %v1211_v62, %v1210_v18  ;;  %v3703_v62 = vld [vmem:[%s3958_s5 + $0x1] ss:$0 sm:$0xff] }
 0x16c   : > { %v1217_v28 = vpack.c.bf16 %v1207_v15, %v1206_v12 }
 0x16e   : > { %2906 = vmatmul.mubr.msk.bf16.gmra.mxu1 %vm767_vm0, %v1217_v28  ;;  %v3114_v28 = vld [vmem:[%s3955_s2 + $0x18] sm:$0xff]  }
 0x16f   : > { %2909 = vmatprep.mubr.msk.bf16.mxu1 %vm767_vm0, %v1218_v0  ;;  %2949 = vmatprep.subr.bf16.mxu0 %v3114_v28 }
 0x176   : > { %2910 = vmatmul.mubr.msk.bf16.gmra.mxu1 %vm767_vm0, %v1219_v31 }
 0x214   : > { %v2899_v20 = vpop.f32.mrf.mxu1 }
 0x215   : > { %v1302_v22 = vadd.f32 %v2899_v20, %v3655_v36 }
 0x216   : > { %v1293_v38 = vpop.f32.mrf.mxu1 }
 0x217   : > { %v1294_v21 = vadd.f32 %v3655_v36, %v1293_v38  ;;  %vm1358_vm4 = vcmp.ge.f32.partialorder %v1302_v22, 0.0 }
 0x218   : > { %v2900_v16 = vpop.f32.mrf.mxu1  ;;  %v1374_v51 = vsel %vm1358_vm4, 1.0, %v3179_v56 }
 0x219   : > { %v1305_v23 = vadd.f32 %v2900_v16, %v3655_v36  ;;  %vm1356_vm2 = vcmp.ge.f32.partialorder %v1294_v21, 0.0 }
 0x21a   : > { %v1296_v26 = vpop.f32.mrf.mxu1  ;;  %v1372_v58 = vsel %vm1356_vm2, 1.0, %v3179_v56 }
 0x21b   : > { %vm1359_vm3 = vcmp.ge.f32.partialorder %v1305_v23, 0.0  ;;  %v1297_v25 = vadd.f32 %v3655_v36, %v1296_v26 }
 0x21c   : > { %v1375_v29 = vsel %vm1359_vm3, 1.0, %v3179_v56 }
 0x21d   : > { %vm1357_vm5 = vcmp.ge.f32.partialorder %v1297_v25, 0.0  ;;  %v1389_v63 = vpack.c.bf16 %v1375_v29, %v1374_v51 }
 0x21e   : > { %v1373_v61 = vsel %vm1357_vm5, 1.0, %v3179_v56  ;;  %v2903_v34 = vpop.f32.mrf.mxu1 }
 0x21f   : > { %v1388_v32 = vpack.c.bf16 %v1373_v61, %v1372_v58  ;;  %v1318_v39 = vadd.f32 %v2903_v34, %v3655_v36 }
 0x220   : > { %v1309_v2 = vpop.f32.mrf.mxu1 }
 0x221   : > { %2915 = vmatprep.mubr.msk.bf16.mxu0 %vm767_vm0, %v1388_v32  ;;  %v1310_v37 = vadd.f32 %v3655_v36, %v1309_v2  ;;  %vm1362_vm8 = vcmp.ge.f32.partialorder %v1318_v39, 0.0 }
 0x222   : > { %2916 = vmatmul.mubr.msk.bf16.vlgmr.msra.gmra.mxu0 %vm767_vm0, %v1389_v63  ;;  %v2904_v40 = vpop.f32.mrf.mxu1  ;;  %v1378_v50 = vsel %vm1362_vm8, 1.0, %v3179_v56 }
 0x223   : > { %v1321_v42 = vadd.f32 %v2904_v40, %v3655_v36  ;;  %vm1360_vm6 = vcmp.ge.f32.partialorder %v1310_v37, 0.0  ;;  %2950 = vmatpush3.bf16.msra.mxu0 %v3114_v28 }
 0x224   : > { %v1312_v49 = vpop.f32.mrf.mxu1  ;;  %v1376_v47 = vsel %vm1360_vm6, 1.0, %v3179_v56 }
 0x225   : > { %vm1363_vm7 = vcmp.ge.f32.partialorder %v1321_v42, 0.0  ;;  %v1313_v52 = vadd.f32 %v3655_v36, %v1312_v49 }
 0x226   : > { %v1379_v45 = vsel %vm1363_vm7, 1.0, %v3179_v56 }
 0x227   : > { %vm1361_vm9 = vcmp.ge.f32.partialorder %v1313_v52, 0.0  ;;  %v1391_v55 = vpack.c.bf16 %v1379_v45, %v1378_v50 }
 0x228   : > { %v1377_v5 = vsel %vm1361_vm9, 1.0, %v3179_v56 }
 0x229   : > { %v1390_v53 = vpack.c.bf16 %v1377_v5, %v1376_v47 }
 0x22b   : > { %2919 = vmatprep.mubr.msk.bf16.mxu0 %vm767_vm0, %v1390_v53 }
 0x22c   : > { %2920 = vmatmul.mubr.msk.bf16.gmra.mxu0 %vm767_vm0, %v1391_v55 }
 0x22e   : > { %v2907_v57 = vpop.f32.mrf.mxu1 }
 0x22f   : > { %v1334_v54 = vadd.f32 %v2907_v57, %v3655_v36 }
 0x230   : > { %v1325_v35 = vpop.f32.mrf.mxu1 }
 0x231   : > { %v1326_v4 = vadd.f32 %v3655_v36, %v1325_v35  ;;  %vm1366_vm12 = vcmp.ge.f32.partialorder %v1334_v54, 0.0 }
 0x232   : > { %v2908_v11 = vpop.f32.mrf.mxu1  ;;  %v1382_v48 = vsel %vm1366_vm12, 1.0, %v3179_v56 }
 0x233   : > { %v1337_v3 = vadd.f32 %v2908_v11, %v3655_v36  ;;  %vm1364_vm10 = vcmp.ge.f32.partialorder %v1326_v4, 0.0 }
 0x234   : > { %v1328_v14 = vpop.f32.mrf.mxu1  ;;  %v1380_v59 = vsel %vm1364_vm10, 1.0, %v3179_v56 }
 0x235   : > { %vm1367_vm11 = vcmp.ge.f32.partialorder %v1337_v3, 0.0  ;;  %v1329_v41 = vadd.f32 %v3655_v36, %v1328_v14 }
 0x236   : > { %v2911_v44 = vpop.f32.mrf.mxu1  ;;  %v1383_v9 = vsel %vm1367_vm11, 1.0, %v3179_v56 }
 0x237   : > { %vm1365_vm13 = vcmp.ge.f32.partialorder %v1329_v41, 0.0  ;;  %v1393_v7 = vpack.c.bf16 %v1383_v9, %v1382_v48  ;;  %v1350_v8 = vadd.f32 %v2911_v44, %v3655_v36 }
 0x238   : > { %v1381_v60 = vsel %vm1365_vm13, 1.0, %v3179_v56  ;;  %v1341_v46 = vpop.f32.mrf.mxu1 }
 0x239   : > { %v1392_v43 = vpack.c.bf16 %v1381_v60, %v1380_v59  ;;  %v1342_v30 = vadd.f32 %v3655_v36, %v1341_v46  ;;  %vm1370_vm1 = vcmp.ge.f32.partialorder %v1350_v8, 0.0 }
 0x23a   : > { %v2912_v13 = vpop.f32.mrf.mxu1  ;;  %v1386_v15 = vsel %vm1370_vm1, 1.0, %v3179_v56 }
 0x23b   : > { %v1353_v17 = vadd.f32 %v2912_v13, %v3655_v36  ;;  %2923 = vmatprep.mubr.msk.bf16.mxu0 %vm767_vm0, %v1392_v43  ;;  %vm1368_vm14 = vcmp.ge.f32.partialorder %v1342_v30, 0.0 }
 0x23c   : > { %v1344_v27 = vpop.f32.mrf.mxu1  ;;  %2924 = vmatmul.mubr.msk.bf16.gmra.mxu0 %vm767_vm0, %v1393_v7  ;;  %v1384_v19 = vsel %vm1368_vm14, 1.0, %v3179_v56 }
 0x23d   : > { %vm1371_vm15 = vcmp.ge.f32.partialorder %v1353_v17, 0.0  ;;  %v1345_v10 = vadd.f32 %v3655_v36, %v1344_v27 }
 0x23e   : > { %v1387_v6 = vsel %vm1371_vm15, 1.0, %v3179_v56 }
 0x23f   : > { %vm1369_vm2 = vcmp.ge.f32.partialorder %v1345_v10, 0.0  ;;  %v1395_v24 = vpack.c.bf16 %v1387_v6, %v1386_v15  ;;  %v3751_v15 = vld [vmem:[%s3958_s5 + $0x2] ss:$0 sm:$0xff] }
 0x240   : > { %v1385_v12 = vsel %vm1369_vm2, 1.0, %v3179_v56 }
 0x241   : > { %v1394_v1 = vpack.c.bf16 %v1385_v12, %v1384_v19  ;;  %v3115_v19 = vld [vmem:[%s3955_s2 + $0x20] sm:$0xff]  }
 0x242   : > { %2967 = vmatprep.subr.bf16.mxu1 %v3115_v19 }
 0x243   : > { %2927 = vmatprep.mubr.msk.bf16.mxu0 %vm767_vm0, %v1394_v1 }
 0x244   : > { %2928 = vmatmul.mubr.msk.bf16.gmra.mxu0 %vm767_vm0, %v1395_v24 }
 0x2e2   : > { %v2917_v0 = vpop.f32.mrf.mxu0 }
 0x2e3   : > { %v1480_v33 = vadd.f32 %v2917_v0, %v3703_v62 }
 0x2e4   : > { %v1471_v18 = vpop.f32.mrf.mxu0 }
 0x2e5   : > { %v1472_v31 = vadd.f32 %v3703_v62, %v1471_v18  ;;  %vm1536_vm5 = vcmp.ge.f32.partialorder %v1480_v33, 0.0 }
 0x2e6   : > { %v2918_v20 = vpop.f32.mrf.mxu0  ;;  %v1552_v26 = vsel %vm1536_vm5, 1.0, %v3179_v56 }
 0x2e7   : > { %v1483_v36 = vadd.f32 %v2918_v20, %v3703_v62  ;;  %vm1534_vm3 = vcmp.ge.f32.partialorder %v1472_v31, 0.0 }
 0x2e8   : > { %v1474_v38 = vpop.f32.mrf.mxu0  ;;  %v1550_v16 = vsel %vm1534_vm3, 1.0, %v3179_v56 }
 0x2e9   : > { %vm1537_vm4 = vcmp.ge.f32.partialorder %v1483_v36, 0.0  ;;  %v1475_v21 = vadd.f32 %v3703_v62, %v1474_v38 }
 0x2ea   : > { %v1553_v22 = vsel %vm1537_vm4, 1.0, %v3179_v56 }
 0x2eb   : > { %vm1535_vm6 = vcmp.ge.f32.partialorder %v1475_v21, 0.0  ;;  %v1567_v58 = vpack.c.bf16 %v1553_v22, %v1552_v26 }
 0x2ec   : > { %v1551_v23 = vsel %vm1535_vm6, 1.0, %v3179_v56  ;;  %v2921_v29 = vpop.f32.mrf.mxu0 }
 0x2ed   : > { %v1566_v25 = vpack.c.bf16 %v1551_v23, %v1550_v16  ;;  %v1496_v32 = vadd.f32 %v2921_v29, %v3703_v62 }
 0x2ee   : > { %v1487_v61 = vpop.f32.mrf.mxu0 }
 0x2ef   : > { %2933 = vmatprep.mubr.msk.bf16.mxu1 %vm767_vm0, %v1566_v25  ;;  %v1488_v51 = vadd.f32 %v3703_v62, %v1487_v61  ;;  %vm1540_vm9 = vcmp.ge.f32.partialorder %v1496_v32, 0.0 }
 0x2f0   : > { %2934 = vmatmul.mubr.msk.bf16.vlgmr.msra.gmra.mxu1 %vm767_vm0, %v1567_v58  ;;  %v2922_v34 = vpop.f32.mrf.mxu0  ;;  %v1556_v49 = vsel %vm1540_vm9, 1.0, %v3179_v56 }
 0x2f1   : > { %v1499_v63 = vadd.f32 %v2922_v34, %v3703_v62  ;;  %vm1538_vm7 = vcmp.ge.f32.partialorder %v1488_v51, 0.0  ;;  %2968 = vmatpush3.bf16.msra.mxu1 %v3115_v19 }
 0x2f2   : > { %v1490_v2 = vpop.f32.mrf.mxu0  ;;  %v1554_v40 = vsel %vm1538_vm7, 1.0, %v3179_v56 }
 0x2f3   : > { %vm1541_vm8 = vcmp.ge.f32.partialorder %v1499_v63, 0.0  ;;  %v1491_v37 = vadd.f32 %v3703_v62, %v1490_v2 }
 0x2f4   : > { %v1557_v39 = vsel %vm1541_vm8, 1.0, %v3179_v56 }
 0x2f5   : > { %vm1539_vm10 = vcmp.ge.f32.partialorder %v1491_v37, 0.0  ;;  %v1569_v45 = vpack.c.bf16 %v1557_v39, %v1556_v49 }
 0x2f6   : > { %v1555_v42 = vsel %vm1539_vm10, 1.0, %v3179_v56 }
 0x2f7   : > { %v1568_v52 = vpack.c.bf16 %v1555_v42, %v1554_v40 }
 0x2f9   : > { %2937 = vmatprep.mubr.msk.bf16.mxu1 %vm767_vm0, %v1568_v52 }
 0x2fa   : > { %2938 = vmatmul.mubr.msk.bf16.gmra.mxu1 %vm767_vm0, %v1569_v45 }
 0x2fc   : > { %v2925_v47 = vpop.f32.mrf.mxu0 }
 0x2fd   : > { %v1512_v53 = vadd.f32 %v2925_v47, %v3703_v62 }
 0x2fe   : > { %v1503_v5 = vpop.f32.mrf.mxu0 }
 0x2ff   : > { %v1504_v50 = vadd.f32 %v3703_v62, %v1503_v5  ;;  %vm1544_vm13 = vcmp.ge.f32.partialorder %v1512_v53, 0.0 }
 0x300   : > { %v2926_v55 = vpop.f32.mrf.mxu0  ;;  %v1560_v44 = vsel %vm1544_vm13, 1.0, %v3179_v56 }
 0x301   : > { %v1515_v57 = vadd.f32 %v2926_v55, %v3703_v62  ;;  %vm1542_vm11 = vcmp.ge.f32.partialorder %v1504_v50, 0.0 }
 0x302   : > { %v1506_v35 = vpop.f32.mrf.mxu0  ;;  %v1558_v3 = vsel %vm1542_vm11, 1.0, %v3179_v56 }
 0x303   : > { %vm1545_vm12 = vcmp.ge.f32.partialorder %v1515_v57, 0.0  ;;  %v1507_v4 = vadd.f32 %v3703_v62, %v1506_v35 }
 0x304   : > { %v2929_v54 = vpop.f32.mrf.mxu0  ;;  %v1561_v11 = vsel %vm1545_vm12, 1.0, %v3179_v56 }
 0x305   : > { %vm1543_vm14 = vcmp.ge.f32.partialorder %v1507_v4, 0.0  ;;  %v1571_v60 = vpack.c.bf16 %v1561_v11, %v1560_v44  ;;  %v1528_v46 = vadd.f32 %v2929_v54, %v3703_v62 }
 0x306   : > { %v1559_v14 = vsel %vm1543_vm14, 1.0, %v3179_v56  ;;  %v1519_v41 = vpop.f32.mrf.mxu0 }
 0x307   : > { %v1570_v9 = vpack.c.bf16 %v1559_v14, %v1558_v3  ;;  %v1520_v59 = vadd.f32 %v3703_v62, %v1519_v41  ;;  %vm1548_vm2 = vcmp.ge.f32.partialorder %v1528_v46, 0.0 }
 0x308   : > { %v2930_v48 = vpop.f32.mrf.mxu0  ;;  %v1564_v27 = vsel %vm1548_vm2, 1.0, %v3179_v56 }
 0x309   : > { %v1531_v43 = vadd.f32 %v2930_v48, %v3703_v62  ;;  %2941 = vmatprep.mubr.msk.bf16.mxu1 %vm767_vm0, %v1570_v9  ;;  %vm1546_vm15 = vcmp.ge.f32.partialorder %v1520_v59, 0.0 }
 0x30a   : > { %v1522_v30 = vpop.f32.mrf.mxu0  ;;  %2942 = vmatmul.mubr.msk.bf16.gmra.mxu1 %vm767_vm0, %v1571_v60  ;;  %v1562_v13 = vsel %vm1546_vm15, 1.0, %v3179_v56 }
 0x30b   : > { %vm1549_vm1 = vcmp.ge.f32.partialorder %v1531_v43, 0.0  ;;  %v1523_v7 = vadd.f32 %v3703_v62, %v1522_v30 }
 0x30c   : > { %v1565_v8 = vsel %vm1549_vm1, 1.0, %v3179_v56 }
 0x30d   : > { %vm1547_vm3 = vcmp.ge.f32.partialorder %v1523_v7, 0.0  ;;  %v1573_v6 = vpack.c.bf16 %v1565_v8, %v1564_v27  ;;  %v3799_v27 = vld [vmem:[%s3958_s5 + $0x3] ss:$0 sm:$0xff] }
 0x30e   : > { %v1563_v17 = vsel %vm1547_vm3, 1.0, %v3179_v56 }
 0x30f   : > { %v1572_v10 = vpack.c.bf16 %v1563_v17, %v1562_v13  ;;  %v3116_v13 = vld [vmem:[%s3956_s3] sm:$0xff]  }
 0x310   : > { %2985 = vmatprep.subr.bf16.mxu0 %v3116_v13 }
 0x311   : > { %2945 = vmatprep.mubr.msk.bf16.mxu1 %vm767_vm0, %v1572_v10 }
 0x312   : > { %2946 = vmatmul.mubr.msk.bf16.gmra.mxu1 %vm767_vm0, %v1573_v6 }
 0x3b0   : > { %v2935_v12 = vpop.f32.mrf.mxu1 }
 0x3b1   : > { %v1658_v28 = vadd.f32 %v2935_v12, %v3751_v15 }
 0x3b2   : > { %v1649_v1 = vpop.f32.mrf.mxu1 }
 0x3b3   : > { %v1650_v24 = vadd.f32 %v3751_v15, %v1649_v1  ;;  %vm1714_vm6 = vcmp.ge.f32.partialorder %v1658_v28, 0.0 }
 0x3b4   : > { %v2936_v0 = vpop.f32.mrf.mxu1  ;;  %v1730_v38 = vsel %vm1714_vm6, 1.0, %v3179_v56 }
 0x3b5   : > { %v1661_v62 = vadd.f32 %v2936_v0, %v3751_v15  ;;  %vm1712_vm4 = vcmp.ge.f32.partialorder %v1650_v24, 0.0 }
 0x3b6   : > { %v1652_v18 = vpop.f32.mrf.mxu1  ;;  %v1728_v20 = vsel %vm1712_vm4, 1.0, %v3179_v56 }
 0x3b7   : > { %vm1715_vm5 = vcmp.ge.f32.partialorder %v1661_v62, 0.0  ;;  %v1653_v31 = vadd.f32 %v3751_v15, %v1652_v18 }
 0x3b8   : > { %v1731_v33 = vsel %vm1715_vm5, 1.0, %v3179_v56 }
 0x3b9   : > { %vm1713_vm7 = vcmp.ge.f32.partialorder %v1653_v31, 0.0  ;;  %v1745_v16 = vpack.c.bf16 %v1731_v33, %v1730_v38 }
 0x3ba   : > { %v1729_v36 = vsel %vm1713_vm7, 1.0, %v3179_v56  ;;  %v2939_v22 = vpop.f32.mrf.mxu1 }
 0x3bb   : > { %v1744_v21 = vpack.c.bf16 %v1729_v36, %v1728_v20  ;;  %v1674_v25 = vadd.f32 %v2939_v22, %v3751_v15 }
 0x3bc   : > { %v1665_v23 = vpop.f32.mrf.mxu1 }
 0x3bd   : > { %2951 = vmatprep.mubr.msk.bf16.mxu0 %vm767_vm0, %v1744_v21  ;;  %v1666_v26 = vadd.f32 %v3751_v15, %v1665_v23  ;;  %vm1718_vm10 = vcmp.ge.f32.partialorder %v1674_v25, 0.0 }
 0x3be   : > { %2952 = vmatmul.mubr.msk.bf16.vlgmr.msra.gmra.mxu0 %vm767_vm0, %v1745_v16  ;;  %v2940_v29 = vpop.f32.mrf.mxu1  ;;  %v1734_v2 = vsel %vm1718_vm10, 1.0, %v3179_v56 }
 0x3bf   : > { %v1677_v58 = vadd.f32 %v2940_v29, %v3751_v15  ;;  %vm1716_vm8 = vcmp.ge.f32.partialorder %v1666_v26, 0.0  ;;  %2986 = vmatpush3.bf16.msra.mxu0 %v3116_v13 }
 0x3c0   : > { %v1668_v61 = vpop.f32.mrf.mxu1  ;;  %v1732_v34 = vsel %vm1716_vm8, 1.0, %v3179_v56 }
 0x3c1   : > { %vm1719_vm9 = vcmp.ge.f32.partialorder %v1677_v58, 0.0  ;;  %v1669_v51 = vadd.f32 %v3751_v15, %v1668_v61 }
 0x3c2   : > { %v1735_v32 = vsel %vm1719_vm9, 1.0, %v3179_v56 }
 0x3c3   : > { %vm1717_vm11 = vcmp.ge.f32.partialorder %v1669_v51, 0.0  ;;  %v1747_v39 = vpack.c.bf16 %v1735_v32, %v1734_v2 }
 0x3c4   : > { %v1733_v63 = vsel %vm1717_vm11, 1.0, %v3179_v56 }
 0x3c5   : > { %v1746_v37 = vpack.c.bf16 %v1733_v63, %v1732_v34 }
 0x3c7   : > { %2955 = vmatprep.mubr.msk.bf16.mxu0 %vm767_vm0, %v1746_v37 }
 0x3c8   : > { %2956 = vmatmul.mubr.msk.bf16.gmra.mxu0 %vm767_vm0, %v1747_v39 }
 0x3ca   : > { %v2943_v40 = vpop.f32.mrf.mxu1 }
 0x3cb   : > { %v1690_v52 = vadd.f32 %v2943_v40, %v3751_v15 }
 0x3cc   : > { %v1681_v42 = vpop.f32.mrf.mxu1 }
 0x3cd   : > { %v1682_v49 = vadd.f32 %v3751_v15, %v1681_v42  ;;  %vm1722_vm14 = vcmp.ge.f32.partialorder %v1690_v52, 0.0 }
 0x3ce   : > { %v2944_v45 = vpop.f32.mrf.mxu1  ;;  %v1738_v54 = vsel %vm1722_vm14, 1.0, %v3179_v56 }
 0x3cf   : > { %v1693_v47 = vadd.f32 %v2944_v45, %v3751_v15  ;;  %vm1720_vm12 = vcmp.ge.f32.partialorder %v1682_v49, 0.0 }
 0x3d0   : > { %v1684_v5 = vpop.f32.mrf.mxu1  ;;  %v1736_v57 = vsel %vm1720_vm12, 1.0, %v3179_v56 }
 0x3d1   : > { %vm1723_vm13 = vcmp.ge.f32.partialorder %v1693_v47, 0.0  ;;  %v1685_v50 = vadd.f32 %v3751_v15, %v1684_v5 }
 0x3d2   : > { %v2947_v53 = vpop.f32.mrf.mxu1  ;;  %v1739_v55 = vsel %vm1723_vm13, 1.0, %v3179_v56 }
 0x3d3   : > { %vm1721_vm15 = vcmp.ge.f32.partialorder %v1685_v50, 0.0  ;;  %v1749_v14 = vpack.c.bf16 %v1739_v55, %v1738_v54  ;;  %v1706_v41 = vadd.f32 %v2947_v53, %v3751_v15 }
 0x3d4   : > { %v1737_v35 = vsel %vm1721_vm15, 1.0, %v3179_v56  ;;  %v1697_v4 = vpop.f32.mrf.mxu1 }
 0x3d5   : > { %v1748_v11 = vpack.c.bf16 %v1737_v35, %v1736_v57  ;;  %v1698_v3 = vadd.f32 %v3751_v15, %v1697_v4  ;;  %vm1726_vm3 = vcmp.ge.f32.partialorder %v1706_v41, 0.0 }
 0x3d6   : > { %v2948_v44 = vpop.f32.mrf.mxu1  ;;  %v1742_v30 = vsel %vm1726_vm3, 1.0, %v3179_v56 }
 0x3d7   : > { %v1709_v9 = vadd.f32 %v2948_v44, %v3751_v15  ;;  %2959 = vmatprep.mubr.msk.bf16.mxu0 %vm767_vm0, %v1748_v11  ;;  %vm1724_vm1 = vcmp.ge.f32.partialorder %v1698_v3, 0.0 }
 0x3d8   : > { %v1700_v59 = vpop.f32.mrf.mxu1  ;;  %2960 = vmatmul.mubr.msk.bf16.gmra.mxu0 %vm767_vm0, %v1749_v14  ;;  %v1740_v48 = vsel %vm1724_vm1, 1.0, %v3179_v56 }
 0x3d9   : > { %vm1727_vm2 = vcmp.ge.f32.partialorder %v1709_v9, 0.0  ;;  %v1701_v60 = vadd.f32 %v3751_v15, %v1700_v59 }
 0x3da   : > { %v1743_v46 = vsel %vm1727_vm2, 1.0, %v3179_v56 }
 0x3db   : > { %vm1725_vm4 = vcmp.ge.f32.partialorder %v1701_v60, 0.0  ;;  %v1751_v8 = vpack.c.bf16 %v1743_v46, %v1742_v30 }
 0x3dc   : > { %v1741_v43 = vsel %vm1725_vm4, 1.0, %v3179_v56 }
 0x3dd   : > { %v1750_v7 = vpack.c.bf16 %v1741_v43, %v1740_v48  ;;  %v3844_v43 = vld [vmem:[%s3958_s5 + $0x4] ss:$0 sm:$0xff] }
 0x3df   : > { %2963 = vmatprep.mubr.msk.bf16.mxu0 %vm767_vm0, %v1750_v7 }
 0x3e0   : > { %2964 = vmatmul.mubr.msk.bf16.gmra.mxu0 %vm767_vm0, %v1751_v8 }
 0x47e   : > { %v2953_v17 = vpop.f32.mrf.mxu0 }
 0x47f   : > { %v1836_v19 = vadd.f32 %v2953_v17, %v3799_v27 }
 0x480   : > { %v1827_v10 = vpop.f32.mrf.mxu0 }
 0x481   : > { %v1828_v6 = vadd.f32 %v3799_v27, %v1827_v10  ;;  %vm1892_vm7 = vcmp.ge.f32.partialorder %v1836_v19, 0.0 }
 0x482   : > { %v2954_v12 = vpop.f32.mrf.mxu0  ;;  %v1908_v18 = vsel %vm1892_vm7, 1.0, %v3179_v56 }
 0x483   : > { %v1839_v15 = vadd.f32 %v2954_v12, %v3799_v27  ;;  %vm1890_vm5 = vcmp.ge.f32.partialorder %v1828_v6, 0.0 }
 0x484   : > { %v1830_v1 = vpop.f32.mrf.mxu0  ;;  %v1906_v0 = vsel %vm1890_vm5, 1.0, %v3179_v56 }
 0x485   : > { %vm1893_vm6 = vcmp.ge.f32.partialorder %v1839_v15, 0.0  ;;  %v1831_v24 = vadd.f32 %v3799_v27, %v1830_v1 }
 0x486   : > { %v1909_v28 = vsel %vm1893_vm6, 1.0, %v3179_v56 }
 0x487   : > { %vm1891_vm8 = vcmp.ge.f32.partialorder %v1831_v24, 0.0  ;;  %v1923_v20 = vpack.c.bf16 %v1909_v28, %v1908_v18 }
 0x488   : > { %v1907_v62 = vsel %vm1891_vm8, 1.0, %v3179_v56  ;;  %v2957_v33 = vpop.f32.mrf.mxu0 }
 0x489   : > { %v1922_v31 = vpack.c.bf16 %v1907_v62, %v1906_v0  ;;  %v1852_v21 = vadd.f32 %v2957_v33, %v3799_v27 }
 0x48a   : > { %v1843_v36 = vpop.f32.mrf.mxu0 }
 0x48b   : > { %2969 = vmatprep.mubr.msk.bf16.mxu1 %vm767_vm0, %v1922_v31  ;;  %v1844_v38 = vadd.f32 %v3799_v27, %v1843_v36  ;;  %vm1896_vm11 = vcmp.ge.f32.partialorder %v1852_v21, 0.0 }
 0x48c   : > { %2970 = vmatmul.mubr.msk.bf16.vlgmr.msra.gmra.mxu1 %vm767_vm0, %v1923_v20  ;;  %v2958_v22 = vpop.f32.mrf.mxu0  ;;  %v1912_v61 = vsel %vm1896_vm11, 1.0, %v3179_v56 }
 0x48d   : > { %v1855_v16 = vadd.f32 %v2958_v22, %v3799_v27  ;;  %vm1894_vm9 = vcmp.ge.f32.partialorder %v1844_v38, 0.0 }
 0x48e   : > { %v1846_v23 = vpop.f32.mrf.mxu0  ;;  %v1910_v29 = vsel %vm1894_vm9, 1.0, %v3179_v56 }
 0x48f   : > { %vm1897_vm10 = vcmp.ge.f32.partialorder %v1855_v16, 0.0  ;;  %v1847_v26 = vadd.f32 %v3799_v27, %v1846_v23 }
 0x490   : > { %v1913_v25 = vsel %vm1897_vm10, 1.0, %v3179_v56 }
 0x491   : > { %vm1895_vm12 = vcmp.ge.f32.partialorder %v1847_v26, 0.0  ;;  %v1925_v32 = vpack.c.bf16 %v1913_v25, %v1912_v61 }
 0x492   : > { %v1911_v58 = vsel %vm1895_vm12, 1.0, %v3179_v56 }
 0x493   : > { %v1924_v51 = vpack.c.bf16 %v1911_v58, %v1910_v29 }
 0x495   : > { %2973 = vmatprep.mubr.msk.bf16.mxu1 %vm767_vm0, %v1924_v51 }
 0x496   : > { %2974 = vmatmul.mubr.msk.bf16.gmra.mxu1 %vm767_vm0, %v1925_v32 }
 0x498   : > { %v2961_v34 = vpop.f32.mrf.mxu0 }
 0x499   : > { %v1868_v37 = vadd.f32 %v2961_v34, %v3799_v27 }
 0x49a   : > { %v1859_v63 = vpop.f32.mrf.mxu0 }
 0x49b   : > { %v1860_v2 = vadd.f32 %v3799_v27, %v1859_v63  ;;  %vm1900_vm15 = vcmp.ge.f32.partialorder %v1868_v37, 0.0 }
 0x49c   : > { %v2962_v39 = vpop.f32.mrf.mxu0  ;;  %v1916_v53 = vsel %vm1900_vm15, 1.0, %v3179_v56 }
 0x49d   : > { %v1871_v40 = vadd.f32 %v2962_v39, %v3799_v27  ;;  %vm1898_vm13 = vcmp.ge.f32.partialorder %v1860_v2, 0.0 }
 0x49e   : > { %v1862_v42 = vpop.f32.mrf.mxu0  ;;  %v1914_v47 = vsel %vm1898_vm13, 1.0, %v3179_v56 }
 0x49f   : > { %vm1901_vm14 = vcmp.ge.f32.partialorder %v1871_v40, 0.0  ;;  %v1863_v49 = vadd.f32 %v3799_v27, %v1862_v42 }
 0x4a0   : > { %v2965_v52 = vpop.f32.mrf.mxu0  ;;  %v1917_v45 = vsel %vm1901_vm14, 1.0, %v3179_v56 }
 0x4a1   : > { %vm1899_vm1 = vcmp.ge.f32.partialorder %v1863_v49, 0.0  ;;  %v1927_v35 = vpack.c.bf16 %v1917_v45, %v1916_v53  ;;  %v1884_v4 = vadd.f32 %v2965_v52, %v3799_v27 }
 0x4a2   : > { %v1915_v5 = vsel %vm1899_vm1, 1.0, %v3179_v56  ;;  %v1875_v50 = vpop.f32.mrf.mxu0 }
 0x4a3   : > { %v1926_v55 = vpack.c.bf16 %v1915_v5, %v1914_v47  ;;  %v1876_v57 = vadd.f32 %v3799_v27, %v1875_v50  ;;  %vm1904_vm4 = vcmp.ge.f32.partialorder %v1884_v4, 0.0 }
 0x4a4   : > { %v2966_v54 = vpop.f32.mrf.mxu0  ;;  %v1920_v59 = vsel %vm1904_vm4, 1.0, %v3179_v56 }
 0x4a5   : > { %v1887_v11 = vadd.f32 %v2966_v54, %v3799_v27  ;;  %2977 = vmatprep.mubr.msk.bf16.mxu1 %vm767_vm0, %v1926_v55  ;;  %vm1902_vm2 = vcmp.ge.f32.partialorder %v1876_v57, 0.0 }
 0x4a6   : > { %v1878_v3 = vpop.f32.mrf.mxu0  ;;  %2978 = vmatmul.mubr.msk.bf16.gmra.mxu1 %vm767_vm0, %v1927_v35  ;;  %v1918_v44 = vsel %vm1902_vm2, 1.0, %v3179_v56 }
 0x4a7   : > { %vm1905_vm3 = vcmp.ge.f32.partialorder %v1887_v11, 0.0  ;;  %v1879_v14 = vadd.f32 %v3799_v27, %v1878_v3 }
 0x4a8   : > { %v1921_v41 = vsel %vm1905_vm3, 1.0, %v3179_v56 }
 0x4a9   : > { %vm1903_vm5 = vcmp.ge.f32.partialorder %v1879_v14, 0.0  ;;  %v1929_v46 = vpack.c.bf16 %v1921_v41, %v1920_v59 }
 0x4aa   : > { %v1919_v9 = vsel %vm1903_vm5, 1.0, %v3179_v56 }
 0x4ab   : > { %v1928_v60 = vpack.c.bf16 %v1919_v9, %v1918_v44  ;;  %v2527_v44 = vld [vmem:[%s3959_s6] ss:$0 sm:$0xff] }
 0x4ad   : > { %2981 = vmatprep.mubr.msk.bf16.mxu1 %vm767_vm0, %v1928_v60 }
 0x4ae   : > { %2982 = vmatmul.mubr.msk.bf16.gmra.mxu1 %vm767_vm0, %v1929_v46 }
 0x54c   : > { %v2971_v48 = vpop.f32.mrf.mxu1 }
 0x54d   : > { %v2014_v8 = vadd.f32 %v2971_v48, %v3844_v43 }
 0x54e   : > { %v2005_v30 = vpop.f32.mrf.mxu1 }
 0x54f   : > { %v2006_v7 = vadd.f32 %v3844_v43, %v2005_v30  ;;  %vm2070_vm8 = vcmp.ge.f32.partialorder %v2014_v8, 0.0 }
 0x550   : > { %v2972_v13 = vpop.f32.mrf.mxu1  ;;  %v2086_v15 = vsel %vm2070_vm8, 1.0, %v3179_v56 }
 0x551   : > { %v2017_v17 = vadd.f32 %v2972_v13, %v3844_v43  ;;  %vm2068_vm6 = vcmp.ge.f32.partialorder %v2006_v7, 0.0 }
 0x552   : > { %v2008_v27 = vpop.f32.mrf.mxu1  ;;  %v2084_v19 = vsel %vm2068_vm6, 1.0, %v3179_v56 }
 0x553   : > { %vm2071_vm7 = vcmp.ge.f32.partialorder %v2017_v17, 0.0  ;;  %v2009_v10 = vadd.f32 %v3844_v43, %v2008_v27 }
 0x554   : > { %v2087_v6 = vsel %vm2071_vm7, 1.0, %v3179_v56 }
 0x555   : > { %vm2069_vm9 = vcmp.ge.f32.partialorder %v2009_v10, 0.0  ;;  %v2101_v28 = vpack.c.bf16 %v2087_v6, %v2086_v15 }
 0x556   : > { %v2085_v12 = vsel %vm2069_vm9, 1.0, %v3179_v56  ;;  %v2975_v24 = vpop.f32.mrf.mxu1 }
 0x557   : > { %v2100_v1 = vpack.c.bf16 %v2085_v12, %v2084_v19  ;;  %v2030_v18 = vadd.f32 %v2975_v24, %v3844_v43 }
 0x558   : > { %v2021_v0 = vpop.f32.mrf.mxu1 }
 0x559   : > { %2987 = vmatprep.mubr.msk.bf16.mxu0 %vm767_vm0, %v2100_v1  ;;  %v2022_v62 = vadd.f32 %v3844_v43, %v2021_v0  ;;  %vm2074_vm12 = vcmp.ge.f32.partialorder %v2030_v18, 0.0 }
 0x55a   : > { %2988 = vmatmul.mubr.msk.bf16.vlgmr.msra.gmra.mxu0 %vm767_vm0, %v2101_v28  ;;  %v2976_v31 = vpop.f32.mrf.mxu1  ;;  %v2090_v16 = vsel %vm2074_vm12, 1.0, %v3179_v56 }
 0x55b   : > { %v2033_v33 = vadd.f32 %v2976_v31, %v3844_v43  ;;  %vm2072_vm10 = vcmp.ge.f32.partialorder %v2022_v62, 0.0 }
 0x55c   : > { %v2024_v20 = vpop.f32.mrf.mxu1  ;;  %v2088_v21 = vsel %vm2072_vm10, 1.0, %v3179_v56 }
 0x55d   : > { %vm2075_vm11 = vcmp.ge.f32.partialorder %v2033_v33, 0.0  ;;  %v2025_v36 = vadd.f32 %v3844_v43, %v2024_v20 }
 0x55e   : > { %v2091_v38 = vsel %vm2075_vm11, 1.0, %v3179_v56 }
 0x55f   : > { %vm2073_vm13 = vcmp.ge.f32.partialorder %v2025_v36, 0.0  ;;  %v2103_v26 = vpack.c.bf16 %v2091_v38, %v2090_v16 }
 0x560   : > { %v2089_v22 = vsel %vm2073_vm13, 1.0, %v3179_v56 }
 0x561   : > { %v2102_v23 = vpack.c.bf16 %v2089_v22, %v2088_v21 }
 0x563   : > { %2991 = vmatprep.mubr.msk.bf16.mxu0 %vm767_vm0, %v2102_v23 }
 0x564   : > { %2992 = vmatmul.mubr.msk.bf16.gmra.mxu0 %vm767_vm0, %v2103_v26 }
 0x566   : > { %v2979_v25 = vpop.f32.mrf.mxu1 }
 0x567   : > { %v2046_v61 = vadd.f32 %v2979_v25, %v3844_v43 }
 0x568   : > { %v2037_v29 = vpop.f32.mrf.mxu1 }
 0x569   : > { %v2038_v58 = vadd.f32 %v3844_v43, %v2037_v29  ;;  %vm2078_vm1 = vcmp.ge.f32.partialorder %v2046_v61, 0.0 }
 0x56a   : > { %v2980_v51 = vpop.f32.mrf.mxu1  ;;  %v2094_v49 = vsel %vm2078_vm1, 1.0, %v3179_v56 }
 0x56b   : > { %v2049_v32 = vadd.f32 %v2980_v51, %v3844_v43  ;;  %vm2076_vm14 = vcmp.ge.f32.partialorder %v2038_v58, 0.0 }
 0x56c   : > { %v2040_v34 = vpop.f32.mrf.mxu1  ;;  %v2092_v39 = vsel %vm2076_vm14, 1.0, %v3179_v56 }
 0x56d   : > { %vm2079_vm15 = vcmp.ge.f32.partialorder %v2049_v32, 0.0  ;;  %v2041_v63 = vadd.f32 %v3844_v43, %v2040_v34 }
 0x56e   : > { %v2983_v2 = vpop.f32.mrf.mxu1  ;;  %v2095_v37 = vsel %vm2079_vm15, 1.0, %v3179_v56 }
 0x56f   : > { %vm2077_vm2 = vcmp.ge.f32.partialorder %v2041_v63, 0.0  ;;  %v2105_v47 = vpack.c.bf16 %v2095_v37, %v2094_v49  ;;  %v2062_v5 = vadd.f32 %v2983_v2, %v3844_v43 }
 0x570   : > { %v2093_v40 = vsel %vm2077_vm2, 1.0, %v3179_v56  ;;  %v2053_v42 = vpop.f32.mrf.mxu1 }
 0x571   : > { %v2104_v52 = vpack.c.bf16 %v2093_v40, %v2092_v39  ;;  %v2054_v45 = vadd.f32 %v3844_v43, %v2053_v42  ;;  %vm2082_vm5 = vcmp.ge.f32.partialorder %v2062_v5, 0.0 }
 0x572   : > { %v2984_v50 = vpop.f32.mrf.mxu1  ;;  %v2098_v11 = vsel %vm2082_vm5, 1.0, %v3179_v56 }
 0x573   : > { %v2065_v53 = vadd.f32 %v2984_v50, %v3844_v43  ;;  %2995 = vmatprep.mubr.msk.bf16.mxu0 %vm767_vm0, %v2104_v52  ;;  %vm2080_vm3 = vcmp.ge.f32.partialorder %v2054_v45, 0.0 }
 0x574   : > { %v2056_v55 = vpop.f32.mrf.mxu1  ;;  %2996 = vmatmul.mubr.msk.bf16.gmra.mxu0 %vm767_vm0, %v2105_v47  ;;  %v2096_v4 = vsel %vm2080_vm3, 1.0, %v3179_v56 }
 0x575   : > { %vm2083_vm4 = vcmp.ge.f32.partialorder %v2065_v53, 0.0  ;;  %v2057_v57 = vadd.f32 %v3844_v43, %v2056_v55 }
 0x576   : > { %v2099_v35 = vsel %vm2083_vm4, 1.0, %v3179_v56 }
 0x577   : > { %vm2081_vm6 = vcmp.ge.f32.partialorder %v2057_v57, 0.0  ;;  %v2107_v14 = vpack.c.bf16 %v2099_v35, %v2098_v11 }
 0x578   : > { %v2097_v54 = vsel %vm2081_vm6, 1.0, %v3179_v56 }
 0x579   : > { %v2106_v3 = vpack.c.bf16 %v2097_v54, %v2096_v4 }
 0x57b   : > { %2999 = vmatprep.mubr.msk.bf16.mxu0 %vm767_vm0, %v2106_v3 }
 0x57c   : > { %3000 = vmatmul.mubr.msk.bf16.gmra.mxu0 %vm767_vm0, %v2107_v14 }
 0x61a   : > { %v2989_v41 = vpop.f32.mrf.mxu0 }
 0x61b   : > { %v2190_v60 = vadd.f32 %v2989_v41, %v2527_v44 }
 0x61c   : > { %v2181_v9 = vpop.f32.mrf.mxu0 }
 0x61d   : > { %v2182_v56 = vadd.f32 %v2527_v44, %v2181_v9 }
 0x61e   : > { %v2990_v59 = vpop.f32.mrf.mxu0 }
 0x61f   : > { %v2193_v46 = vadd.f32 %v2990_v59, %v2527_v44 }
 0x620   : > { %v2184_v48 = vpop.f32.mrf.mxu0 }
 0x621   : > { %v2583_v43 = vpack.c.bf16 %v2193_v46, %v2190_v60  ;;  %v2185_v30 = vadd.f32 %v2527_v44, %v2184_v48 }
 0x623   : > { %2615 = vst [vmem:[%s3892_s21 + $0x8] sm:$0xff] %v2583_v43   ;;  %v2578_v7 = vpack.c.bf16 %v2185_v30, %v2182_v56 }
 0x624   : > { %v2993_v8 = vpop.f32.mrf.mxu0 }
 0x625   : > { %2579 = vst [vmem:[%s3892_s21] sm:$0xff] %v2578_v7   ;;  %v2206_v27 = vadd.f32 %v2993_v8, %v2527_v44 }
 0x626   : > { %v2197_v13 = vpop.f32.mrf.mxu0 }
 0x627   : > { %v2198_v19 = vadd.f32 %v2527_v44, %v2197_v13 }
 0x628   : > { %v2994_v17 = vpop.f32.mrf.mxu0 }
 0x629   : > { %v2209_v10 = vadd.f32 %v2994_v17, %v2527_v44 }
 0x62a   : > { %v2200_v6 = vpop.f32.mrf.mxu0 }
 0x62b   : > { %v2593_v12 = vpack.c.bf16 %v2209_v10, %v2206_v27  ;;  %v2201_v15 = vadd.f32 %v2527_v44, %v2200_v6 }
 0x62d   : > { %2617 = vst [vmem:[%s3892_s21 + $0x18] sm:$0xff] %v2593_v12   ;;  %v2588_v1 = vpack.c.bf16 %v2201_v15, %v2198_v19 }
 0x62f   : > { %2616 = vst [vmem:[%s3892_s21 + $0x10] sm:$0xff] %v2588_v1  }
 0x634   : > { %v2997_v24 = vpop.f32.mrf.mxu0 }
 0x635   : > { %v2222_v62 = vadd.f32 %v2997_v24, %v2527_v44 }
 0x636   : > { %v2213_v28 = vpop.f32.mrf.mxu0 }
 0x637   : > { %v2214_v33 = vadd.f32 %v2527_v44, %v2213_v28 }
 0x638   : > { %v2998_v0 = vpop.f32.mrf.mxu0 }
 0x639   : > { %v2225_v18 = vadd.f32 %v2998_v0, %v2527_v44 }
 0x63a   : > { %v2216_v31 = vpop.f32.mrf.mxu0 }
 0x63b   : > { %v2603_v20 = vpack.c.bf16 %v2225_v18, %v2222_v62  ;;  %v2217_v36 = vadd.f32 %v2527_v44, %v2216_v31 }
 0x63c   : > { %v3001_v38 = vpop.f32.mrf.mxu0 }
 0x63d   : > { %2619 = vst [vmem:[%s3892_s21 + $0x28] sm:$0xff] %v2603_v20   ;;  %v2598_v21 = vpack.c.bf16 %v2217_v36, %v2214_v33  ;;  %v2238_v23 = vadd.f32 %v3001_v38, %v2527_v44 }
 0x63e   : > { %v2229_v22 = vpop.f32.mrf.mxu0 }
 0x63f   : > { %2618 = vst [vmem:[%s3892_s21 + $0x20] sm:$0xff] %v2598_v21   ;;  %v2230_v29 = vadd.f32 %v2527_v44, %v2229_v22 }
 0x640   : > { %v3002_v16 = vpop.f32.mrf.mxu0 }
 0x641   : > { %v2241_v26 = vadd.f32 %v3002_v16, %v2527_v44 }
 0x642   : > { %v2232_v25 = vpop.f32.mrf.mxu0 }
 0x643   : > { %v2613_v58 = vpack.c.bf16 %v2241_v26, %v2238_v23  ;;  %v2233_v61 = vadd.f32 %v2527_v44, %v2232_v25 }
 0x645   : > { %2621 = vst [vmem:[%s3892_s21 + $0x38] sm:$0xff] %v2613_v58   ;;  %v2608_v51 = vpack.c.bf16 %v2233_v61, %v2230_v29 }
 0x647   : > { %2620 = vst [vmem:[%s3892_s21 + $0x30] sm:$0xff] %v2608_v51  }
 0x648   : > { %3130 = shalt.err (!%p3127_p3)
}
 0x649   : > { %s3131_s18 = scalar_lea.hbm %s3905_s13, 1024  ;;  %s3135_s15 = scalar_lea.hbm %s3960_s7, 2048 }
 0x64a   : > { %p3132_p4 = scmp.ne.s32.totalorder %s3905_s13, %s3131_s18  ;;  %p3136_p9 = scmp.lt.s32.totalorder %s3905_s13, %s3960_s7 }
 0x64b   : > { %p3137_p10 = scmp.lt.s32.totalorder %s3135_s15, %s3131_s18 }
 0x64c   : > { %p3133_p7 = pnand %p3132_p4, %p3261_p5 }
 0x64d   : > { %p3138_p11 = por %p3137_p10, %p3136_p9 }
 0x64e   : > { %p3134_p8 = pneg %p3133_p7 }
 0x650   : > { %p3139_p12 = pnand %p3138_p11, %p3134_p8 }
 0x652   : > { %3142 = shalt.err (!%p3139_p12)
}
 0x653   : > { %s3181_s29 = smov 64   ;;  %s3182_s9 = smov 4  }
 0x654   : > { %3020 = dma.vmem_to_hbm [thread:$0]  (%p3261_p5), %s3907_s22, 1024, %s3905_s13, %s3913_s28, %s3181_s29, %s3181_s29, %s3182_s9  }
 0x655 PF: > { %p3026_p13 = scmp.ge.s32.totalorder %s3177_s27, 2  ;;  %s2353_s8 = sand.u32 1, %s3165_s24  }
 0x656   : > { %s2354_s14 = scalar_lea.sflag [#allocation3], %s2353_s8 }
 0x657   : > { %p3023_p0 = pnand %p3026_p13, %p3265_p6 }
 0x659   : > { %p3024_p1 = pneg %p3023_p0 }
 0x65b   : > { %3160 = dma.done.wait (%p3024_p1), %s2354_s14, 1024  }
 0x65c   : > { %3162 = vsyncadd (%p3024_p1), %s2354_s14, 4294966272  ;;  %p17_p2 = scmp.ge.s32.totalorder %s3248_s30, 4   ;;  %s3969_s24 = smov %s3169_s25 }
 0x65d   : > { %s3970_s25 = smov %s3173_s26  ;;  %s3971_s26 = smov %s3259_s10 }
 0x65e   : > { %s3972_s27 = smov %s3248_s30  ;;  %19 = sbr.rel (!%p17_p2) target bundleno = 3 (0x3), region = 91 }
 0x663   :  { %2359 = vsyncpa [#allocation3], 1 }
 0x664   :  { %2361 = vsyncpa [#allocation3 + $0x1], 1 }

</bundles_post_ra>
